<compile_context>
chip_gen: v7x
topology: tpu7x:2x2x1
jax: 0.10.0
libtpu: 0.0.40
codegen_flags: <defaults>
</compile_context>

<pallas_src>
import functools

import jax
import jax.numpy as jnp
from jax.experimental import pallas as pl
from jax.experimental.pallas import tpu as pltpu

BATCH_SIZE = 33  # mirrors the PyTorch module's global


# ---------------------------------------------------------------------------
# Fused kernel: all RNN layers (wavefront) + FC in one grid-less pallas_call.
# ---------------------------------------------------------------------------
def _fused_rnn_fc_kernel(num_layers, seq_len, batch_p, *refs):
    """Whole model in one kernel.

    refs layout (inputs, outputs, scratch):
      x_ref                                  (T*Bp, D_in)   time-major, flat
      [w_ih_t, w_hh_t, bias] * num_layers    (D_l, H), (H, H), (1, H)
      w_fc_t, b_fc                           (H, Op), (1, Op)   lane-padded
      out_ref                                (T*Bp, Op)
      hn_ref                                 (num_layers, Bp, H)
      xproj_scr (VMEM scratch)               (T*Bp, H)   layer-0 projections
      y_scr     (VMEM scratch)               (T*Bp, H)   last-layer outputs
    """
    x_ref = refs[0]
    layer_refs = refs[1:1 + 3 * num_layers]
    w_fc_ref = refs[1 + 3 * num_layers]
    b_fc_ref = refs[2 + 3 * num_layers]
    out_ref = refs[3 + 3 * num_layers]
    hn_ref = refs[4 + 3 * num_layers]
    xproj_scr = refs[5 + 3 * num_layers]
    y_scr = refs[6 + 3 * num_layers]

    T, Bp = seq_len, batch_p
    H = y_scr.shape[1]

    # ---- Hoist weight loads and bias broadcasts out of the unrolled loops.
    w_ih = [layer_refs[3 * l][...] for l in range(num_layers)]          # (D_l, H)
    w_hh = [layer_refs[3 * l + 1][...] for l in range(num_layers)]      # (H, H)
    # Layer-0 bias is folded into the slab projection (single broadcast);
    # layers >= 1 get a single hoisted (Bp, H) broadcast each.
    bias_b = [None] + [
        jnp.broadcast_to(layer_refs[3 * l + 2][...], (Bp, H))
        for l in range(1, num_layers)
    ]

    # ---- Layer-0 input projection: ONE slab matmul for all timesteps.
    xproj_scr[...] = (
        jnp.dot(x_ref[...], w_ih[0], preferred_element_type=jnp.float32)
        + layer_refs[2][...]                                            # (1, H)
    )

    # ---- Layer-wavefront recurrence: wave w advances layer l at t = w - l.
    h = [jnp.zeros((Bp, H), jnp.float32) for _ in range(num_layers)]
    prev = [None] * num_layers  # output of layer l at its last processed step

    for w in range(T + num_layers - 1):
        snapshot = list(prev)  # layer l-1 output from the previous wave
        for l in range(num_layers):
            t = w - l
            if t < 0 or t >= T:
                continue
            if l == 0:
                pre = xproj_scr[pl.ds(t * Bp, Bp), :]
            else:
                pre = (
                    jnp.dot(snapshot[l - 1], w_ih[l],
                            preferred_element_type=jnp.float32)
                    + bias_b[l]
                )
            h_new = jnp.tanh(
                pre + jnp.dot(h[l], w_hh[l], preferred_element_type=jnp.float32)
            )
            h[l] = h_new
            prev[l] = h_new
            if l == num_layers - 1:
                y_scr[pl.ds(t * Bp, Bp), :] = h_new   # aligned (Bp multiple of 8)

    for l in range(num_layers):
        hn_ref[l] = h[l]

    # ---- FC epilogue: one slab matmul + one dense lane-padded store.
    out_ref[...] = (
        jnp.dot(y_scr[...], w_fc_ref[...], preferred_element_type=jnp.float32)
        + b_fc_ref[...]
    )


def fused_rnn_fc(x, layer_params, w_fc_t, b_fc):
    """x: (B, T, D_in). layer_params: list of (w_ih_t, w_hh_t, bias)."""
    B, T, D = x.shape
    num_layers = len(layer_params)
    H = layer_params[0][1].shape[0]
    O = w_fc_t.shape[1]

    Bp = ((B + 7) // 8) * 8                 # sublane-aligned batch
    Op = ((O + 127) // 128) * 128           # lane-dense output store

    # Time-major, batch-padded, flattened input: (T*Bp, D). One-time XLA ops.
    x_tm = jnp.transpose(x, (1, 0, 2))
    x_tm = jnp.pad(x_tm, ((0, 0), (0, Bp - B), (0, 0)))
    x_flat = jnp.reshape(x_tm, (T * Bp, D))

    # Lane-pad FC weights/bias (zero columns) so the kernel store is dense.
    w_fc_p = jnp.pad(w_fc_t, ((0, 0), (0, Op - O)))
    b_fc_p = jnp.pad(b_fc, ((0, 0), (0, Op - O)))

    flat_weights = []
    for w_ih_t, w_hh_t, bias in layer_params:
        flat_weights += [w_ih_t, w_hh_t, bias]

    n_in = 1 + len(flat_weights) + 2
    vmem_spec = lambda: pl.BlockSpec(memory_space=pltpu.MemorySpace.VMEM)

    out_flat, h_n = pl.pallas_call(
        functools.partial(_fused_rnn_fc_kernel, num_layers, T, Bp),
        out_shape=(
            jax.ShapeDtypeStruct((T * Bp, Op), jnp.float32),
            jax.ShapeDtypeStruct((num_layers, Bp, H), jnp.float32),
        ),
        in_specs=[vmem_spec() for _ in range(n_in)],
        out_specs=(vmem_spec(), vmem_spec()),
        scratch_shapes=[
            pltpu.VMEM((T * Bp, H), jnp.float32),   # layer-0 projections
            pltpu.VMEM((T * Bp, H), jnp.float32),   # last-layer outputs
        ],
    )(x_flat, *flat_weights, w_fc_p, b_fc_p)

    # Un-pad / reorder outside the kernel (cheap XLA ops).
    out = jnp.transpose(jnp.reshape(out_flat, (T, Bp, Op)), (1, 0, 2))[:B, :, :O]
    h_n = h_n[:, :B, :]
    return out, h_n


# ---------------------------------------------------------------------------
# Parameters (PyTorch-style init), stored pre-transposed / pre-fused.
# ---------------------------------------------------------------------------
def init_params(key, input_size, output_size, hidden_size, num_layers):
    bound = 1.0 / (hidden_size ** 0.5)
    layers = []
    for l in range(num_layers):
        d_in = input_size if l == 0 else hidden_size
        key, k1, k2, k3, k4 = jax.random.split(key, 5)
        w_ih = jax.random.uniform(k1, (hidden_size, d_in), jnp.float32, -bound, bound)
        w_hh = jax.random.uniform(k2, (hidden_size, hidden_size), jnp.float32, -bound, bound)
        b_ih = jax.random.uniform(k3, (hidden_size,), jnp.float32, -bound, bound)
        b_hh = jax.random.uniform(k4, (hidden_size,), jnp.float32, -bound, bound)
        layers.append((
            jnp.transpose(w_ih),                    # (d_in, H)
            jnp.transpose(w_hh),                    # (H, H)
            (b_ih + b_hh).reshape(1, hidden_size),  # (1, H)  (= b_ih + b_hh)
        ))
    key, k1, k2 = jax.random.split(key, 3)
    w_fc = jax.random.uniform(k1, (output_size, hidden_size), jnp.float32, -bound, bound)
    b_fc = jax.random.uniform(k2, (output_size,), jnp.float32, -bound, bound)
    return {
        "layers": layers,
        "fc_w_t": jnp.transpose(w_fc),          # (H, O)
        "fc_b": b_fc.reshape(1, output_size),   # (1, O)
    }


# ---------------------------------------------------------------------------
# Module wrapper (mirrors RNN.forward)
# ---------------------------------------------------------------------------
def rnn_forward(params, x):
    """Equivalent of RNN.forward. x: (B, T, input_size)."""
    num_layers = len(params["layers"])
    H = params["layers"][0][1].shape[0]
    B = x.shape[0]

    if B == BATCH_SIZE:  # same gate as the PyTorch module
        out, hidden_state = fused_rnn_fc(
            x, params["layers"], params["fc_w_t"], params["fc_b"])
        return out, hidden_state

    # Mirrors the PyTorch quirk: if len(x) != BATCH_SIZE the RNN is skipped and
    # fc is applied to the raw input (shape-errors unless input_size == hidden
    # size, exactly as in the original module).
    hidden_state = jnp.zeros((num_layers, BATCH_SIZE, H), jnp.float32)
    out = jnp.dot(x, params["fc_w_t"]) + params["fc_b"]
    return out, hidden_state


def rnn_forward_reference(params, x):
    """Pure-JAX reference for correctness checking."""
    output = x
    h_finals = []
    for w_ih_t, w_hh_t, bias in params["layers"]:
        h = jnp.zeros((x.shape[0], w_hh_t.shape[0]), jnp.float32)
        ys = []
        for t in range(output.shape[1]):
            h = jnp.tanh(output[:, t, :] @ w_ih_t + h @ w_hh_t + bias)
            ys.append(h)
        output = jnp.stack(ys, axis=1)
        h_finals.append(h)
    h_n = jnp.stack(h_finals, axis=0)
    out = output @ params["fc_w_t"] + params["fc_b"]
    return out, h_n


if __name__ == "__main__":
    input_size = 16
    output_size = 10
    hidden_size = 32
    num_layers = 2
    seq_len = 8
    batch = BATCH_SIZE  # forward only runs the RNN when len(x) == BATCH_SIZE

    key = jax.random.PRNGKey(0)
    kx, kp = jax.random.split(key)
    x = jax.random.normal(kx, (batch, seq_len, input_size), jnp.float32)
    params = init_params(kp, input_size, output_size, hidden_size, num_layers)

    out, h_n = rnn_forward(params, x)
    out = jax.block_until_ready(out)
    h_n = jax.block_until_ready(h_n)

    ref_out, ref_h = rnn_forward_reference(params, x)
    assert out.shape == (batch, seq_len, output_size)
    assert h_n.shape == (num_layers, batch, hidden_size)
    assert jnp.allclose(out, ref_out, atol=1e-5, rtol=1e-5)
    assert jnp.allclose(h_n, ref_h, atol=1e-5, rtol=1e-5)

    print("KERNEL_OK")
</pallas_src>

<mosaic_0001>
module attributes {stable_mosaic.version = 11 : i64} {
  func.func @_fused_rnn_fc_kernel(%arg0: memref<320x16xf32, #tpu.memory_space<vmem>>, %arg1: memref<16x32xf32, #tpu.memory_space<vmem>>, %arg2: memref<32x32xf32, #tpu.memory_space<vmem>>, %arg3: memref<1x32xf32, #tpu.memory_space<vmem>>, %arg4: memref<32x32xf32, #tpu.memory_space<vmem>>, %arg5: memref<32x32xf32, #tpu.memory_space<vmem>>, %arg6: memref<1x32xf32, #tpu.memory_space<vmem>>, %arg7: memref<32x128xf32, #tpu.memory_space<vmem>>, %arg8: memref<1x128xf32, #tpu.memory_space<vmem>>, %arg9: memref<320x128xf32, #tpu.memory_space<vmem>>, %arg10: memref<2x40x32xf32, #tpu.memory_space<vmem>>, %arg11: memref<320x32xf32, #tpu.memory_space<vmem>>, %arg12: memref<320x32xf32, #tpu.memory_space<vmem>>) attributes {dimension_semantics = [], scalar_prefetch = 0 : i64, scratch_operands = 2 : i64, tpu.core_type = #tpu.core_type<tc>} {
    %c0 = arith.constant 0 : index
    %c0_0 = arith.constant 0 : index
    %0 = vector.load %arg1[%c0, %c0_0] : memref<16x32xf32, #tpu.memory_space<vmem>>, vector<16x32xf32>
    %c0_1 = arith.constant 0 : index
    %c0_2 = arith.constant 0 : index
    %1 = vector.load %arg4[%c0_1, %c0_2] : memref<32x32xf32, #tpu.memory_space<vmem>>, vector<32x32xf32>
    %c0_3 = arith.constant 0 : index
    %c0_4 = arith.constant 0 : index
    %2 = vector.load %arg2[%c0_3, %c0_4] : memref<32x32xf32, #tpu.memory_space<vmem>>, vector<32x32xf32>
    %c0_5 = arith.constant 0 : index
    %c0_6 = arith.constant 0 : index
    %3 = vector.load %arg5[%c0_5, %c0_6] : memref<32x32xf32, #tpu.memory_space<vmem>>, vector<32x32xf32>
    %c0_7 = arith.constant 0 : index
    %c0_8 = arith.constant 0 : index
    %4 = vector.load %arg6[%c0_7, %c0_8] : memref<1x32xf32, #tpu.memory_space<vmem>>, vector<1x32xf32>
    %5 = vector.shape_cast %4 : vector<1x32xf32> to vector<1x32xf32>
    %6 = vector.broadcast %5 : vector<1x32xf32> to vector<40x32xf32>
    %c0_9 = arith.constant 0 : index
    %c0_10 = arith.constant 0 : index
    %7 = vector.load %arg0[%c0_9, %c0_10] : memref<320x16xf32, #tpu.memory_space<vmem>>, vector<320x16xf32>
    %cst = arith.constant dense<0.000000e+00> : vector<320x32xf32>
    %8 = tpu.matmul %7, %0, %cst {dimension_numbers = #tpu.dot_dimension_numbers<[1], [0], [0], [1], [0, 0, 1, 1], [], []>} : vector<320x16xf32>, vector<16x32xf32>, vector<320x32xf32> -> vector<320x32xf32>
    %c0_11 = arith.constant 0 : index
    %c0_12 = arith.constant 0 : index
    %9 = vector.load %arg3[%c0_11, %c0_12] : memref<1x32xf32, #tpu.memory_space<vmem>>, vector<1x32xf32>
    %10 = vector.broadcast %9 : vector<1x32xf32> to vector<320x32xf32>
    %11 = arith.addf %8, %10 : vector<320x32xf32>
    %c0_13 = arith.constant 0 : index
    %c0_14 = arith.constant 0 : index
    %12 = vector.load %arg11[%c0_13, %c0_14] : memref<320x32xf32, #tpu.memory_space<vmem>>, vector<320x32xf32>
    tpu.vector_store %arg11[%c0_13, %c0_14], %11 {strides = array<i32>} : memref<320x32xf32, #tpu.memory_space<vmem>>, vector<320x32xf32>,
    %cst_15 = arith.constant 0.000000e+00 : f32
    %13 = vector.broadcast %cst_15 : f32 to vector<40x32xf32>
    %cst_16 = arith.constant 0.000000e+00 : f32
    %14 = vector.broadcast %cst_16 : f32 to vector<40x32xf32>
    %c0_17 = arith.constant 0 : index
    %c0_18 = arith.constant 0 : index
    %15 = vector.load %arg11[%c0_17, %c0_18] : memref<320x32xf32, #tpu.memory_space<vmem>>, vector<40x32xf32>
    %cst_19 = arith.constant dense<0.000000e+00> : vector<40x32xf32>
    %16 = tpu.matmul %13, %2, %cst_19 {dimension_numbers = #tpu.dot_dimension_numbers<[1], [0], [0], [1], [0, 0, 1, 1], [], []>} : vector<40x32xf32>, vector<32x32xf32>, vector<40x32xf32> -> vector<40x32xf32>
    %17 = arith.addf %15, %16 : vector<40x32xf32>
    %18 = math.tanh %17 : vector<40x32xf32>
    %c40 = arith.constant 40 : index
    %c0_20 = arith.constant 0 : index
    %19 = vector.load %arg11[%c40, %c0_20] : memref<320x32xf32, #tpu.memory_space<vmem>>, vector<40x32xf32>
    %cst_21 = arith.constant dense<0.000000e+00> : vector<40x32xf32>
    %20 = tpu.matmul %18, %2, %cst_21 {dimension_numbers = #tpu.dot_dimension_numbers<[1], [0], [0], [1], [0, 0, 1, 1], [], []>} : vector<40x32xf32>, vector<32x32xf32>, vector<40x32xf32> -> vector<40x32xf32>
    %21 = arith.addf %19, %20 : vector<40x32xf32>
    %22 = math.tanh %21 : vector<40x32xf32>
    %cst_22 = arith.constant dense<0.000000e+00> : vector<40x32xf32>
    %23 = tpu.matmul %18, %1, %cst_22 {dimension_numbers = #tpu.dot_dimension_numbers<[1], [0], [0], [1], [0, 0, 1, 1], [], []>} : vector<40x32xf32>, vector<32x32xf32>, vector<40x32xf32> -> vector<40x32xf32>
    %24 = arith.addf %23, %6 : vector<40x32xf32>
    %cst_23 = arith.constant dense<0.000000e+00> : vector<40x32xf32>
    %25 = tpu.matmul %14, %3, %cst_23 {dimension_numbers = #tpu.dot_dimension_numbers<[1], [0], [0], [1], [0, 0, 1, 1], [], []>} : vector<40x32xf32>, vector<32x32xf32>, vector<40x32xf32> -> vector<40x32xf32>
    %26 = arith.addf %24, %25 : vector<40x32xf32>
    %27 = math.tanh %26 : vector<40x32xf32>
    %c0_24 = arith.constant 0 : index
    %c0_25 = arith.constant 0 : index
    %28 = vector.load %arg12[%c0_24, %c0_25] : memref<320x32xf32, #tpu.memory_space<vmem>>, vector<40x32xf32>
    tpu.vector_store %arg12[%c0_24, %c0_25], %27 {strides = array<i32>} : memref<320x32xf32, #tpu.memory_space<vmem>>, vector<40x32xf32>,
    %c80 = arith.constant 80 : index
    %c0_26 = arith.constant 0 : index
    %29 = vector.load %arg11[%c80, %c0_26] : memref<320x32xf32, #tpu.memory_space<vmem>>, vector<40x32xf32>
    %cst_27 = arith.constant dense<0.000000e+00> : vector<40x32xf32>
    %30 = tpu.matmul %22, %2, %cst_27 {dimension_numbers = #tpu.dot_dimension_numbers<[1], [0], [0], [1], [0, 0, 1, 1], [], []>} : vector<40x32xf32>, vector<32x32xf32>, vector<40x32xf32> -> vector<40x32xf32>
    %31 = arith.addf %29, %30 : vector<40x32xf32>
    %32 = math.tanh %31 : vector<40x32xf32>
    %cst_28 = arith.constant dense<0.000000e+00> : vector<40x32xf32>
    %33 = tpu.matmul %22, %1, %cst_28 {dimension_numbers = #tpu.dot_dimension_numbers<[1], [0], [0], [1], [0, 0, 1, 1], [], []>} : vector<40x32xf32>, vector<32x32xf32>, vector<40x32xf32> -> vector<40x32xf32>
    %34 = arith.addf %33, %6 : vector<40x32xf32>
    %cst_29 = arith.constant dense<0.000000e+00> : vector<40x32xf32>
    %35 = tpu.matmul %27, %3, %cst_29 {dimension_numbers = #tpu.dot_dimension_numbers<[1], [0], [0], [1], [0, 0, 1, 1], [], []>} : vector<40x32xf32>, vector<32x32xf32>, vector<40x32xf32> -> vector<40x32xf32>
    %36 = arith.addf %34, %35 : vector<40x32xf32>
    %37 = math.tanh %36 : vector<40x32xf32>
    %c40_30 = arith.constant 40 : index
    %c0_31 = arith.constant 0 : index
    %38 = vector.load %arg12[%c40_30, %c0_31] : memref<320x32xf32, #tpu.memory_space<vmem>>, vector<40x32xf32>
    tpu.vector_store %arg12[%c40_30, %c0_31], %37 {strides = array<i32>} : memref<320x32xf32, #tpu.memory_space<vmem>>, vector<40x32xf32>,
    %c120 = arith.constant 120 : index
    %c0_32 = arith.constant 0 : index
    %39 = vector.load %arg11[%c120, %c0_32] : memref<320x32xf32, #tpu.memory_space<vmem>>, vector<40x32xf32>
    %cst_33 = arith.constant dense<0.000000e+00> : vector<40x32xf32>
    %40 = tpu.matmul %32, %2, %cst_33 {dimension_numbers = #tpu.dot_dimension_numbers<[1], [0], [0], [1], [0, 0, 1, 1], [], []>} : vector<40x32xf32>, vector<32x32xf32>, vector<40x32xf32> -> vector<40x32xf32>
    %41 = arith.addf %39, %40 : vector<40x32xf32>
    %42 = math.tanh %41 : vector<40x32xf32>
    %cst_34 = arith.constant dense<0.000000e+00> : vector<40x32xf32>
    %43 = tpu.matmul %32, %1, %cst_34 {dimension_numbers = #tpu.dot_dimension_numbers<[1], [0], [0], [1], [0, 0, 1, 1], [], []>} : vector<40x32xf32>, vector<32x32xf32>, vector<40x32xf32> -> vector<40x32xf32>
    %44 = arith.addf %43, %6 : vector<40x32xf32>
    %cst_35 = arith.constant dense<0.000000e+00> : vector<40x32xf32>
    %45 = tpu.matmul %37, %3, %cst_35 {dimension_numbers = #tpu.dot_dimension_numbers<[1], [0], [0], [1], [0, 0, 1, 1], [], []>} : vector<40x32xf32>, vector<32x32xf32>, vector<40x32xf32> -> vector<40x32xf32>
    %46 = arith.addf %44, %45 : vector<40x32xf32>
    %47 = math.tanh %46 : vector<40x32xf32>
    %c80_36 = arith.constant 80 : index
    %c0_37 = arith.constant 0 : index
    %48 = vector.load %arg12[%c80_36, %c0_37] : memref<320x32xf32, #tpu.memory_space<vmem>>, vector<40x32xf32>
    tpu.vector_store %arg12[%c80_36, %c0_37], %47 {strides = array<i32>} : memref<320x32xf32, #tpu.memory_space<vmem>>, vector<40x32xf32>,
    %c160 = arith.constant 160 : index
    %c0_38 = arith.constant 0 : index
    %49 = vector.load %arg11[%c160, %c0_38] : memref<320x32xf32, #tpu.memory_space<vmem>>, vector<40x32xf32>
    %cst_39 = arith.constant dense<0.000000e+00> : vector<40x32xf32>
    %50 = tpu.matmul %42, %2, %cst_39 {dimension_numbers = #tpu.dot_dimension_numbers<[1], [0], [0], [1], [0, 0, 1, 1], [], []>} : vector<40x32xf32>, vector<32x32xf32>, vector<40x32xf32> -> vector<40x32xf32>
    %51 = arith.addf %49, %50 : vector<40x32xf32>
    %52 = math.tanh %51 : vector<40x32xf32>
    %cst_40 = arith.constant dense<0.000000e+00> : vector<40x32xf32>
    %53 = tpu.matmul %42, %1, %cst_40 {dimension_numbers = #tpu.dot_dimension_numbers<[1], [0], [0], [1], [0, 0, 1, 1], [], []>} : vector<40x32xf32>, vector<32x32xf32>, vector<40x32xf32> -> vector<40x32xf32>
    %54 = arith.addf %53, %6 : vector<40x32xf32>
    %cst_41 = arith.constant dense<0.000000e+00> : vector<40x32xf32>
    %55 = tpu.matmul %47, %3, %cst_41 {dimension_numbers = #tpu.dot_dimension_numbers<[1], [0], [0], [1], [0, 0, 1, 1], [], []>} : vector<40x32xf32>, vector<32x32xf32>, vector<40x32xf32> -> vector<40x32xf32>
    %56 = arith.addf %54, %55 : vector<40x32xf32>
    %57 = math.tanh %56 : vector<40x32xf32>
    %c120_42 = arith.constant 120 : index
    %c0_43 = arith.constant 0 : index
    %58 = vector.load %arg12[%c120_42, %c0_43] : memref<320x32xf32, #tpu.memory_space<vmem>>, vector<40x32xf32>
    tpu.vector_store %arg12[%c120_42, %c0_43], %57 {strides = array<i32>} : memref<320x32xf32, #tpu.memory_space<vmem>>, vector<40x32xf32>,
    %c200 = arith.constant 200 : index
    %c0_44 = arith.constant 0 : index
    %59 = vector.load %arg11[%c200, %c0_44] : memref<320x32xf32, #tpu.memory_space<vmem>>, vector<40x32xf32>
    %cst_45 = arith.constant dense<0.000000e+00> : vector<40x32xf32>
    %60 = tpu.matmul %52, %2, %cst_45 {dimension_numbers = #tpu.dot_dimension_numbers<[1], [0], [0], [1], [0, 0, 1, 1], [], []>} : vector<40x32xf32>, vector<32x32xf32>, vector<40x32xf32> -> vector<40x32xf32>
    %61 = arith.addf %59, %60 : vector<40x32xf32>
    %62 = math.tanh %61 : vector<40x32xf32>
    %cst_46 = arith.constant dense<0.000000e+00> : vector<40x32xf32>
    %63 = tpu.matmul %52, %1, %cst_46 {dimension_numbers = #tpu.dot_dimension_numbers<[1], [0], [0], [1], [0, 0, 1, 1], [], []>} : vector<40x32xf32>, vector<32x32xf32>, vector<40x32xf32> -> vector<40x32xf32>
    %64 = arith.addf %63, %6 : vector<40x32xf32>
    %cst_47 = arith.constant dense<0.000000e+00> : vector<40x32xf32>
    %65 = tpu.matmul %57, %3, %cst_47 {dimension_numbers = #tpu.dot_dimension_numbers<[1], [0], [0], [1], [0, 0, 1, 1], [], []>} : vector<40x32xf32>, vector<32x32xf32>, vector<40x32xf32> -> vector<40x32xf32>
    %66 = arith.addf %64, %65 : vector<40x32xf32>
    %67 = math.tanh %66 : vector<40x32xf32>
    %c160_48 = arith.constant 160 : index
    %c0_49 = arith.constant 0 : index
    %68 = vector.load %arg12[%c160_48, %c0_49] : memref<320x32xf32, #tpu.memory_space<vmem>>, vector<40x32xf32>
    tpu.vector_store %arg12[%c160_48, %c0_49], %67 {strides = array<i32>} : memref<320x32xf32, #tpu.memory_space<vmem>>, vector<40x32xf32>,
    %c240 = arith.constant 240 : index
    %c0_50 = arith.constant 0 : index
    %69 = vector.load %arg11[%c240, %c0_50] : memref<320x32xf32, #tpu.memory_space<vmem>>, vector<40x32xf32>
    %cst_51 = arith.constant dense<0.000000e+00> : vector<40x32xf32>
    %70 = tpu.matmul %62, %2, %cst_51 {dimension_numbers = #tpu.dot_dimension_numbers<[1], [0], [0], [1], [0, 0, 1, 1], [], []>} : vector<40x32xf32>, vector<32x32xf32>, vector<40x32xf32> -> vector<40x32xf32>
    %71 = arith.addf %69, %70 : vector<40x32xf32>
    %72 = math.tanh %71 : vector<40x32xf32>
    %cst_52 = arith.constant dense<0.000000e+00> : vector<40x32xf32>
    %73 = tpu.matmul %62, %1, %cst_52 {dimension_numbers = #tpu.dot_dimension_numbers<[1], [0], [0], [1], [0, 0, 1, 1], [], []>} : vector<40x32xf32>, vector<32x32xf32>, vector<40x32xf32> -> vector<40x32xf32>
    %74 = arith.addf %73, %6 : vector<40x32xf32>
    %cst_53 = arith.constant dense<0.000000e+00> : vector<40x32xf32>
    %75 = tpu.matmul %67, %3, %cst_53 {dimension_numbers = #tpu.dot_dimension_numbers<[1], [0], [0], [1], [0, 0, 1, 1], [], []>} : vector<40x32xf32>, vector<32x32xf32>, vector<40x32xf32> -> vector<40x32xf32>
    %76 = arith.addf %74, %75 : vector<40x32xf32>
    %77 = math.tanh %76 : vector<40x32xf32>
    %c200_54 = arith.constant 200 : index
    %c0_55 = arith.constant 0 : index
    %78 = vector.load %arg12[%c200_54, %c0_55] : memref<320x32xf32, #tpu.memory_space<vmem>>, vector<40x32xf32>
    tpu.vector_store %arg12[%c200_54, %c0_55], %77 {strides = array<i32>} : memref<320x32xf32, #tpu.memory_space<vmem>>, vector<40x32xf32>,
    %c280 = arith.constant 280 : index
    %c0_56 = arith.constant 0 : index
    %79 = vector.load %arg11[%c280, %c0_56] : memref<320x32xf32, #tpu.memory_space<vmem>>, vector<40x32xf32>
    %cst_57 = arith.constant dense<0.000000e+00> : vector<40x32xf32>
    %80 = tpu.matmul %72, %2, %cst_57 {dimension_numbers = #tpu.dot_dimension_numbers<[1], [0], [0], [1], [0, 0, 1, 1], [], []>} : vector<40x32xf32>, vector<32x32xf32>, vector<40x32xf32> -> vector<40x32xf32>
    %81 = arith.addf %79, %80 : vector<40x32xf32>
    %82 = math.tanh %81 : vector<40x32xf32>
    %cst_58 = arith.constant dense<0.000000e+00> : vector<40x32xf32>
    %83 = tpu.matmul %72, %1, %cst_58 {dimension_numbers = #tpu.dot_dimension_numbers<[1], [0], [0], [1], [0, 0, 1, 1], [], []>} : vector<40x32xf32>, vector<32x32xf32>, vector<40x32xf32> -> vector<40x32xf32>
    %84 = arith.addf %83, %6 : vector<40x32xf32>
    %cst_59 = arith.constant dense<0.000000e+00> : vector<40x32xf32>
    %85 = tpu.matmul %77, %3, %cst_59 {dimension_numbers = #tpu.dot_dimension_numbers<[1], [0], [0], [1], [0, 0, 1, 1], [], []>} : vector<40x32xf32>, vector<32x32xf32>, vector<40x32xf32> -> vector<40x32xf32>
    %86 = arith.addf %84, %85 : vector<40x32xf32>
    %87 = math.tanh %86 : vector<40x32xf32>
    %c240_60 = arith.constant 240 : index
    %c0_61 = arith.constant 0 : index
    %88 = vector.load %arg12[%c240_60, %c0_61] : memref<320x32xf32, #tpu.memory_space<vmem>>, vector<40x32xf32>
    tpu.vector_store %arg12[%c240_60, %c0_61], %87 {strides = array<i32>} : memref<320x32xf32, #tpu.memory_space<vmem>>, vector<40x32xf32>,
    %cst_62 = arith.constant dense<0.000000e+00> : vector<40x32xf32>
    %89 = tpu.matmul %82, %1, %cst_62 {dimension_numbers = #tpu.dot_dimension_numbers<[1], [0], [0], [1], [0, 0, 1, 1], [], []>} : vector<40x32xf32>, vector<32x32xf32>, vector<40x32xf32> -> vector<40x32xf32>
    %90 = arith.addf %89, %6 : vector<40x32xf32>
    %cst_63 = arith.constant dense<0.000000e+00> : vector<40x32xf32>
    %91 = tpu.matmul %87, %3, %cst_63 {dimension_numbers = #tpu.dot_dimension_numbers<[1], [0], [0], [1], [0, 0, 1, 1], [], []>} : vector<40x32xf32>, vector<32x32xf32>, vector<40x32xf32> -> vector<40x32xf32>
    %92 = arith.addf %90, %91 : vector<40x32xf32>
    %93 = math.tanh %92 : vector<40x32xf32>
    %c280_64 = arith.constant 280 : index
    %c0_65 = arith.constant 0 : index
    %94 = vector.load %arg12[%c280_64, %c0_65] : memref<320x32xf32, #tpu.memory_space<vmem>>, vector<40x32xf32>
    tpu.vector_store %arg12[%c280_64, %c0_65], %93 {strides = array<i32>} : memref<320x32xf32, #tpu.memory_space<vmem>>, vector<40x32xf32>,
    %c0_66 = arith.constant 0 : index
    %c0_67 = arith.constant 0 : index
    %c0_68 = arith.constant 0 : index
    %95 = vector.load %arg10[%c0_66, %c0_67, %c0_68] : memref<2x40x32xf32, #tpu.memory_space<vmem>>, vector<1x40x32xf32>
    %96 = vector.shape_cast %95 : vector<1x40x32xf32> to vector<40x32xf32>
    %97 = vector.shape_cast %82 : vector<40x32xf32> to vector<1x40x32xf32>
    tpu.vector_store %arg10[%c0_66, %c0_67, %c0_68], %97 {strides = array<i32>} : memref<2x40x32xf32, #tpu.memory_space<vmem>>, vector<1x40x32xf32>,
    %c1 = arith.constant 1 : index
    %c0_69 = arith.constant 0 : index
    %c0_70 = arith.constant 0 : index
    %98 = vector.load %arg10[%c1, %c0_69, %c0_70] : memref<2x40x32xf32, #tpu.memory_space<vmem>>, vector<1x40x32xf32>
    %99 = vector.shape_cast %98 : vector<1x40x32xf32> to vector<40x32xf32>
    %100 = vector.shape_cast %93 : vector<40x32xf32> to vector<1x40x32xf32>
    tpu.vector_store %arg10[%c1, %c0_69, %c0_70], %100 {strides = array<i32>} : memref<2x40x32xf32, #tpu.memory_space<vmem>>, vector<1x40x32xf32>,
    %c0_71 = arith.constant 0 : index
    %c0_72 = arith.constant 0 : index
    %101 = vector.load %arg12[%c0_71, %c0_72] : memref<320x32xf32, #tpu.memory_space<vmem>>, vector<320x32xf32>
    %c0_73 = arith.constant 0 : index
    %c0_74 = arith.constant 0 : index
    %102 = vector.load %arg7[%c0_73, %c0_74] : memref<32x128xf32, #tpu.memory_space<vmem>>, vector<32x128xf32>
    %cst_75 = arith.constant dense<0.000000e+00> : vector<320x128xf32>
    %103 = tpu.matmul %101, %102, %cst_75 {dimension_numbers = #tpu.dot_dimension_numbers<[1], [0], [0], [1], [0, 0, 1, 1], [], []>} : vector<320x32xf32>, vector<32x128xf32>, vector<320x128xf32> -> vector<320x128xf32>
    %c0_76 = arith.constant 0 : index
    %c0_77 = arith.constant 0 : index
    %104 = vector.load %arg8[%c0_76, %c0_77] : memref<1x128xf32, #tpu.memory_space<vmem>>, vector<1x128xf32>
    %105 = vector.broadcast %104 : vector<1x128xf32> to vector<320x128xf32>
    %106 = arith.addf %103, %105 : vector<320x128xf32>
    %c0_78 = arith.constant 0 : index
    %c0_79 = arith.constant 0 : index
    %107 = vector.load %arg9[%c0_78, %c0_79] : memref<320x128xf32, #tpu.memory_space<vmem>>, vector<320x128xf32>
    tpu.vector_store %arg9[%c0_78, %c0_79], %106 {strides = array<i32>} : memref<320x128xf32, #tpu.memory_space<vmem>>, vector<320x128xf32>,
    return
  }
}

</mosaic_0001>

<bundles_post_ra>
// kernel: tpu_custom_call.1
= control target key start
LH: loop header
LB: loop body
LE: loop exit
PB: predicated region body
PF: predicated region fallthrough
CT: control target
= control target key end

     0   :  { %vm103_vm0 = vcmask 130048   ;;  %v5318_v8 = vmov 0.0|0.0   ;;  %s6373_s0 = inlined_call_operand.vmem [shape: f32[320,16], index: 0, kind: input, shape index: {}]   ;;  %s6374_s1 = inlined_call_operand.vmem [shape: f32[16,32], index: 1, kind: input, shape index: {}]   ;;  %s6375_s2 = inlined_call_operand.vmem [shape: f32[32,32], index: 2, kind: input, shape index: {}]   ;;  %s6376_s3 = inlined_call_operand.vmem [shape: f32[1,32], index: 3, kind: input, shape index: {}]   ;;  %s6377_s4 = inlined_call_operand.vmem [shape: f32[32,32], index: 4, kind: input, shape index: {}]   ;;  %s6378_s5 = inlined_call_operand.vmem [shape: f32[32,32], index: 5, kind: input, shape index: {}]   ;;  %s6379_s6 = inlined_call_operand.vmem [shape: f32[1,32], index: 6, kind: input, shape index: {}]   ;;  %s6380_s7 = inlined_call_operand.vmem [shape: f32[32,128], index: 7, kind: input, shape index: {}]   ;;  %s6381_s8 = inlined_call_operand.vmem [shape: f32[1,128], index: 8, kind: input, shape index: {}]   ;;  %s6382_s9 = inlined_call_operand.hbm [shape: f32[320,128], index: 9, kind: output, shape index: {0}]   ;;  %s6383_s10 = inlined_call_operand.vmem [shape: f32[2,40,32], index: 10, kind: output, shape index: {1}]  }
   0x1   :  { %v35_v0 = vld [vmem:[%s6374_s1] sm:$0xff]  ;;  %v36_v1 = vld [vmem:[%s6374_s1 + $0x8] sm:$0xff]  ;;  %v78_v9 = vld [vmem:[%s6373_s0 + $0xb0] sm:$0xff] }
   0x2   :  { %v76_v2 = vld [vmem:[%s6373_s0 + $0xa0] sm:$0xff]  ;;  %v4849_v3 = vpack.c.bf16 %v36_v1, %v35_v0  ;;  %v42_v5 = vld [vmem:[%s6375_s2 + $0x8] sm:$0xff]  ;;  %v43_v10 = vld [vmem:[%s6375_s2 + $0x10] sm:$0xff] }
   0x3   :  { %4199 = vmatprep.mubr.msk.f32.mxu1 %vm103_vm0, %v76_v2  ;;  %v41_v4 = vld [vmem:[%s6375_s2] sm:$0xff]  ;;  %v77_v6 = vld [vmem:[%s6373_s0 + $0xa8] sm:$0xff]  ;;  %v44_v11 = vld [vmem:[%s6375_s2 + $0x18] sm:$0xff] }
   0x4   :  { %5005 = vmatprep.subr.bf16.mxu1 %v4849_v3  ;;  %4850 = vmatprep.subr.bf16.mxu0 %v4849_v3  ;;  %v5398_v7 = vpack.c.bf16 %v42_v5, %v41_v4  ;;  %v56_v12 = vld [vmem:[%s6373_s0] sm:$0xff]  ;;  %v57_v13 = vld [vmem:[%s6373_s0 + $0x8] sm:$0xff]  ;;  %v79_v14 = vld [vmem:[%s6373_s0 + $0xb8] sm:$0xff]  ;;  %v5423_v15 = vpack.c.bf16 %v44_v11, %v43_v10 }
   0x5   :  { %5006 = vmatpush3.bf16.msra.mxu1 %v4849_v3  ;;  %4852 = vmatpush3.bf16.msra.mxu0 %v4849_v3  ;;  %v80_v16 = vld [vmem:[%s6373_s0 + $0xc0] sm:$0xff]  ;;  %v58_v17 = vld [vmem:[%s6373_s0 + $0x10] sm:$0xff]  ;;  %v59_v18 = vld [vmem:[%s6373_s0 + $0x18] sm:$0xff] }
   0x6   :  { %4853 = vmatprep.subr.bf16.mxu1 %v5318_v8  ;;  %4877 = vmatprep.subr.bf16.mxu0 %v5318_v8 }
   0x7   :  { %4169 = vmatprep.mubr.msk.f32.mxu0 %vm103_vm0, %v56_v12 }
   0x8   :  { %4200 = vmatmul.mubr.msk.f32.vlgmr.msra.gmra.mrb[0].mxu1 %vm103_vm0, %v77_v6  ;;  %4170 = vmatmul.mubr.msk.f32.vlgmr.msra.gmra.mrb[0].mxu0 %vm103_vm0, %v57_v13 }
   0x9   :  { %4855 = vmatpush3.bf16.msra.mxu1 %v5398_v7  ;;  %4202 = vmatprep.mubr.msk.f32.mxu1 %vm103_vm0, %v78_v9 }
   0xa   :  { %4856 = vmatprep.subr.bf16.mxu1 %v5318_v8  ;;  %4172 = vmatprep.mubr.msk.f32.mxu0 %vm103_vm0, %v58_v17 }
   0xc   :  { %4203 = vmatmul.mubr.msk.f32.gmra.mrb[2].mxu1 %vm103_vm0, %v79_v14 }
   0xd   :  { %16 = vsyncpa [#allocation5], 0  ;;  %4205 = vmatprep.mubr.msk.f32.mxu1 %vm103_vm0, %v80_v16  ;;  %v81_v19 = vld [vmem:[%s6373_s0 + $0xc8] sm:$0xff]  ;;  %4858 = vmatpush3.bf16.msra.mxu1 %v5423_v15  ;;  %v60_v20 = vld [vmem:[%s6373_s0 + $0x20] sm:$0xff]  ;;  %vm5319_vm1 = vmmov 0   ;;  %v5320_v36 = vmov 0.0  }
   0xe   :  { %v82_v21 = vld [vmem:[%s6373_s0 + $0xd0] sm:$0xff]  ;;  %4859 = vmatprep.subr.bf16.mxu1 %v5318_v8  ;;  %4879 = vmatpush3.bf16.msra.mxu0 %v5398_v7  ;;  %v61_v22 = vld [vmem:[%s6373_s0 + $0x28] sm:$0xff]  ;;  %v83_v23 = vld [vmem:[%s6373_s0 + $0xd8] sm:$0xff]  ;;  %vm489_vm2 = vcmask 261120  }
   0xf   :  { %4173 = vmatmul.mubr.msk.f32.gmra.mrb[2].mxu0 %vm103_vm0, %v59_v18  ;;  %4880 = vmatprep.subr.bf16.mxu0 %v5318_v8  ;;  %v84_v24 = vld [vmem:[%s6373_s0 + $0xe0] sm:$0xff]  ;;  %v85_v25 = vld [vmem:[%s6373_s0 + $0xe8] sm:$0xff]  ;;  %v86_v26 = vld [vmem:[%s6373_s0 + $0xf0] sm:$0xff] }
  0x10   :  { %4206 = vmatmul.mubr.msk.f32.gmra.mrb[4].mxu1 %vm103_vm0, %v81_v19  ;;  %4175 = vmatprep.mubr.msk.f32.mxu0 %vm103_vm0, %v60_v20  ;;  %v87_v27 = vld [vmem:[%s6373_s0 + $0xf8] sm:$0xff]  ;;  %v88_v28 = vld [vmem:[%s6373_s0 + $0x100] sm:$0xff]  ;;  %v89_v29 = vld [vmem:[%s6373_s0 + $0x108] sm:$0xff] }
  0x11   :  { %4208 = vmatprep.mubr.msk.f32.mxu1 %vm103_vm0, %v82_v21  ;;  %v90_v30 = vld [vmem:[%s6373_s0 + $0x110] sm:$0xff]  ;;  %v91_v31 = vld [vmem:[%s6373_s0 + $0x118] sm:$0xff]  ;;  %v92_v32 = vld [vmem:[%s6373_s0 + $0x120] sm:$0xff] }
  0x12   :  { %4882 = vmatpush3.bf16.msra.mxu0 %v5423_v15  ;;  %v93_v33 = vld [vmem:[%s6373_s0 + $0x128] sm:$0xff]  ;;  %v94_v34 = vld [vmem:[%s6373_s0 + $0x130] sm:$0xff]  ;;  %v95_v35 = vld [vmem:[%s6373_s0 + $0x138] sm:$0xff] }
  0x13   :  { %4176 = vmatmul.mubr.msk.f32.gmra.mrb[4].mxu0 %vm103_vm0, %v61_v22  ;;  %4895 = vmatprep.subr.bf16.mxu0 %v5318_v8  ;;  %v62_v37 = vld [vmem:[%s6373_s0 + $0x30] sm:$0xff]  ;;  %v63_v38 = vld [vmem:[%s6373_s0 + $0x38] sm:$0xff]  ;;  %v64_v39 = vld [vmem:[%s6373_s0 + $0x40] sm:$0xff] }
  0x14   :  { %4209 = vmatmul.mubr.msk.f32.gmra.mrb[6].mxu1 %vm103_vm0, %v83_v23  ;;  %4178 = vmatprep.mubr.msk.f32.mxu0 %vm103_vm0, %v62_v37  ;;  %v65_v40 = vld [vmem:[%s6373_s0 + $0x48] sm:$0xff]  ;;  %v5555_v41 = vld [vmem:[%s6376_s3] ss:$0 sm:$0xff]  ;;  %v66_v50 = vld [vmem:[%s6373_s0 + $0x50] sm:$0xff] }
  0x15   :  { %4211 = vmatprep.mubr.msk.f32.mxu1 %vm103_vm0, %v84_v24  ;;  %v67_v54 = vld [vmem:[%s6373_s0 + $0x58] sm:$0xff]  ;;  %v68_v55 = vld [vmem:[%s6373_s0 + $0x60] sm:$0xff]  ;;  %v69_v58 = vld [vmem:[%s6373_s0 + $0x68] sm:$0xff] }
  0x17   :  { %4179 = vmatmul.mubr.msk.f32.gmra.mrb[6].mxu0 %vm103_vm0, %v63_v38 }
  0x18   :  { %4212 = vmatmul.mubr.msk.f32.gmra.mrb[8].mxu1 %vm103_vm0, %v85_v25  ;;  %4181 = vmatprep.mubr.msk.f32.mxu0 %vm103_vm0, %v64_v39 }
  0x19   :  { %4214 = vmatprep.mubr.msk.f32.mxu1 %vm103_vm0, %v86_v26 }
  0x1b   :  { %4182 = vmatmul.mubr.msk.f32.gmra.mrb[8].mxu0 %vm103_vm0, %v65_v40 }
  0x1c   :  { %4215 = vmatmul.mubr.msk.f32.gmra.mrb[10].mxu1 %vm103_vm0, %v87_v27  ;;  %4184 = vmatprep.mubr.msk.f32.mxu0 %vm103_vm0, %v66_v50  ;;  %v38_v50 = vld [vmem:[%s6377_s4 + $0x8] sm:$0xff] }
  0x1d   :  { %4217 = vmatprep.mubr.msk.f32.mxu1 %vm103_vm0, %v88_v28 }
  0x1f   :  { %4185 = vmatmul.mubr.msk.f32.gmra.mrb[10].mxu0 %vm103_vm0, %v67_v54 }
  0x20   :  { %4218 = vmatmul.mubr.msk.f32.gmra.mrb[12].mxu1 %vm103_vm0, %v89_v29  ;;  %4187 = vmatprep.mubr.msk.f32.mxu0 %vm103_vm0, %v68_v55 }
  0x21   :  { %4220 = vmatprep.mubr.msk.f32.mxu1 %vm103_vm0, %v90_v30 }
  0x23   :  { %4188 = vmatmul.mubr.msk.f32.gmra.mrb[12].mxu0 %vm103_vm0, %v69_v58 }
  0x24   :  { %4221 = vmatmul.mubr.msk.f32.gmra.mrb[14].mxu1 %vm103_vm0, %v91_v31 }
  0x25   :  { %4223 = vmatprep.mubr.msk.f32.mxu1 %vm103_vm0, %v92_v32 }
  0x28   :  { %4224 = vmatmul.mubr.msk.f32.gmra.mrb[16].mxu1 %vm103_vm0, %v93_v33 }
  0x29   :  { %4226 = vmatprep.mubr.msk.f32.mxu1 %vm103_vm0, %v94_v34 }
  0x2c   :  { %4227 = vmatmul.mubr.msk.f32.gmra.mrb[18].mxu1 %vm103_vm0, %v95_v35 }
  0x2d   :  { %4237 = vmatprep.mubr.msk.f32.mxu1 %vm5319_vm1, %v5320_v36 }
  0x30   :  { %4238 = vmatmul.mubr.f32.vlgmr.msra.gmra.mrb[20].mxu1 %v5320_v36 }
  0x31   :  { %4240 = vmatprep.mubr.msk.f32.mxu1 %vm5319_vm1, %v5320_v36  ;;  %4861 = vmatpush3.bf16.msra.mxu1 %v5398_v7 }
  0x32   :  { %4862 = vmatprep.subr.bf16.mxu1 %v5318_v8 }
  0x34   :  { %4241 = vmatmul.mubr.f32.gmra.mrb[22].mxu1 %v5320_v36 }
  0x35   :  { %4243 = vmatprep.mubr.msk.f32.mxu1 %vm5319_vm1, %v5320_v36  ;;  %4864 = vmatpush3.bf16.msra.mxu1 %v5423_v15 }
  0x36   :  { %4865 = vmatprep.subr.bf16.mxu1 %v5318_v8 }
  0x38   :  { %4244 = vmatmul.mubr.f32.gmra.mrb[24].mxu1 %v5320_v36 }
  0x39   :  { %4246 = vmatprep.mubr.msk.f32.mxu1 %vm5319_vm1, %v5320_v36 }
  0x3c   :  { %4247 = vmatmul.mubr.f32.gmra.mrb[26].mxu1 %v5320_v36 }
  0x3d   :  { %4249 = vmatprep.mubr.msk.f32.mxu1 %vm5319_vm1, %v5320_v36 }
  0x40   :  { %4250 = vmatmul.mubr.f32.gmra.mrb[28].mxu1 %v5320_v36 }
  0x41   :  { %4260 = vmatprep.mubr.msk.f32.mxu1 %vm5319_vm1, %v5320_v36 }
  0xdb   :  { %v4201_v42 = vpop.f32.mrb[0].mxu1  ;;  %v4171_v46 = vpop.f32.mrb[0].mxu0 }
  0xdc   :  { %v396_v43 = vadd.f32 %v4201_v42, %v5555_v41  ;;  %v390_v44 = vpop.f32.mrb[1].mxu1  ;;  %v296_v48 = vadd.f32 %v4171_v46, %v5555_v41  ;;  %v290_v49 = vpop.f32.mrb[1].mxu0 }
  0xdd   :  { %v391_v45 = vadd.f32 %v5555_v41, %v390_v44  ;;  %v291_v53 = vadd.f32 %v5555_v41, %v290_v49  ;;  %v37_v49 = vld [vmem:[%s6377_s4] sm:$0xff] }
  0xde   :  { %511 = vst.msk [vmem:[#allocation2 + $0xa8] sm:$0xff] %vm489_vm2, %v396_v43  ;;  %491 = vst.msk [vmem:[#allocation2 + $0x8] sm:$0xff] %vm489_vm2, %v296_v48 }
  0xdf   :  { %510 = vst.msk [vmem:[#allocation2 + $0xa0] sm:$0xff] %vm489_vm2, %v391_v45  ;;  %v4204_v47 = vpop.f32.mrb[2].mxu1  ;;  %490 = vst.msk [vmem:[#allocation2] sm:$0xff] %vm489_vm2, %v291_v53  ;;  %v5631_v53 = vpack.c.bf16 %v38_v50, %v37_v49 }
  0xe0   :  { %v406_v51 = vadd.f32 %v4204_v47, %v5555_v41  ;;  %v400_v52 = vpop.f32.mrb[3].mxu1 }
  0xe1   :  { %v401_v56 = vadd.f32 %v5555_v41, %v400_v52 }
  0xe2   :  { %513 = vst.msk [vmem:[#allocation2 + $0xb8] sm:$0xff] %vm489_vm2, %v406_v51  ;;  %v4174_v57 = vpop.f32.mrb[2].mxu0 }
  0xe3   :  { %512 = vst.msk [vmem:[#allocation2 + $0xb0] sm:$0xff] %vm489_vm2, %v401_v56  ;;  %v4207_v59 = vpop.f32.mrb[4].mxu1  ;;  %v306_v60 = vadd.f32 %v4174_v57, %v5555_v41  ;;  %v300_v61 = vpop.f32.mrb[3].mxu0  ;;  %v39_v56 = vld [vmem:[%s6377_s4 + $0x10] sm:$0xff]  ;;  %v40_v57 = vld [vmem:[%s6377_s4 + $0x18] sm:$0xff] }
  0xe4   :  { %v416_v62 = vadd.f32 %v4207_v59, %v5555_v41  ;;  %v410_v63 = vpop.f32.mrb[5].mxu1  ;;  %v301_v0 = vadd.f32 %v5555_v41, %v300_v61 }
  0xe5   :  { %v411_v1 = vadd.f32 %v5555_v41, %v410_v63  ;;  %493 = vst.msk [vmem:[#allocation2 + $0x18] sm:$0xff] %vm489_vm2, %v306_v60  ;;  %v531_v43 = vld [vmem:[#allocation2 + $0x8] sm:$0xff] }
  0xe6   :  { %515 = vst.msk [vmem:[#allocation2 + $0xc8] sm:$0xff] %vm489_vm2, %v416_v62  ;;  %492 = vst.msk [vmem:[#allocation2 + $0x10] sm:$0xff] %vm489_vm2, %v301_v0  ;;  %v4177_v2 = vpop.f32.mrb[4].mxu0  ;;  %v530_v38 = vld [vmem:[#allocation2] sm:$0xff]  ;;  %v5643_v62 = vpack.c.bf16 %v40_v57, %v39_v56 }
  0xe7   :  { %514 = vst.msk [vmem:[#allocation2 + $0xc0] sm:$0xff] %vm489_vm2, %v411_v1  ;;  %v4210_v3 = vpop.f32.mrb[6].mxu1  ;;  %v316_v4 = vadd.f32 %v4177_v2, %v5555_v41  ;;  %v310_v5 = vpop.f32.mrb[5].mxu0 }
  0xe8   :  { %v426_v6 = vadd.f32 %v4210_v3, %v5555_v41  ;;  %v420_v9 = vpop.f32.mrb[7].mxu1  ;;  %v311_v10 = vadd.f32 %v5555_v41, %v310_v5  ;;  %v45_v5 = vld [vmem:[%s6378_s5] sm:$0xff] }
  0xe9   :  { %v421_v11 = vadd.f32 %v5555_v41, %v420_v9  ;;  %495 = vst.msk [vmem:[#allocation2 + $0x28] sm:$0xff] %vm489_vm2, %v316_v4 }
  0xea   :  { %517 = vst.msk [vmem:[#allocation2 + $0xd8] sm:$0xff] %vm489_vm2, %v426_v6  ;;  %494 = vst.msk [vmem:[#allocation2 + $0x20] sm:$0xff] %vm489_vm2, %v311_v10  ;;  %v46_v6 = vld [vmem:[%s6378_s5 + $0x8] sm:$0xff] }
  0xeb   :  { %516 = vst.msk [vmem:[#allocation2 + $0xd0] sm:$0xff] %vm489_vm2, %v421_v11  ;;  %v4213_v12 = vpop.f32.mrb[8].mxu1  ;;  %v5666_v10 = vpack.c.bf16 %v46_v6, %v45_v5  ;;  %v47_v11 = vld [vmem:[%s6378_s5 + $0x10] sm:$0xff] }
  0xec   :  { %v436_v13 = vadd.f32 %v4213_v12, %v5555_v41  ;;  %v430_v14 = vpop.f32.mrb[9].mxu1  ;;  %v533_v54 = vld [vmem:[#allocation2 + $0x18] sm:$0xff] }
  0xed   :  { %v431_v16 = vadd.f32 %v5555_v41, %v430_v14  ;;  %v532_v47 = vld [vmem:[#allocation2 + $0x10] sm:$0xff]  ;;  %v48_v12 = vld [vmem:[%s6378_s5 + $0x18] sm:$0xff]  ;;  %v4180_v14 = vpop.f32.mrb[6].mxu0 }
  0xee   :  { %519 = vst.msk [vmem:[#allocation2 + $0xe8] sm:$0xff] %vm489_vm2, %v436_v13  ;;  %v5678_v13 = vpack.c.bf16 %v48_v12, %v47_v11 }
  0xef   :  { %518 = vst.msk [vmem:[#allocation2 + $0xe0] sm:$0xff] %vm489_vm2, %v431_v16  ;;  %v4216_v17 = vpop.f32.mrb[10].mxu1  ;;  %v326_v16 = vadd.f32 %v4180_v14, %v5555_v41 }
  0xf0   :  { %v446_v18 = vadd.f32 %v4216_v17, %v5555_v41  ;;  %v440_v19 = vpop.f32.mrb[11].mxu1  ;;  %v320_v17 = vpop.f32.mrb[7].mxu0 }
  0xf1   :  { %v441_v20 = vadd.f32 %v5555_v41, %v440_v19  ;;  %v534_v61 = vld [vmem:[#allocation2 + $0x20] sm:$0xff]  ;;  %497 = vst.msk [vmem:[#allocation2 + $0x38] sm:$0xff] %vm489_vm2, %v326_v16  ;;  %v70_v19 = vld [vmem:[%s6373_s0 + $0x70] sm:$0xff] }
  0xf2   :  { %521 = vst.msk [vmem:[#allocation2 + $0xf8] sm:$0xff] %vm489_vm2, %v446_v18  ;;  %v321_v18 = vadd.f32 %v5555_v41, %v320_v17  ;;  %4190 = vmatprep.mubr.msk.f32.mxu0 %vm103_vm0, %v70_v19 }
  0xf3   :  { %520 = vst.msk [vmem:[#allocation2 + $0xf0] sm:$0xff] %vm489_vm2, %v441_v20  ;;  %v4219_v21 = vpop.f32.mrb[12].mxu1  ;;  %v4183_v20 = vpop.f32.mrb[8].mxu0 }
  0xf4   :  { %v456_v22 = vadd.f32 %v4219_v21, %v5555_v41  ;;  %v450_v23 = vpop.f32.mrb[13].mxu1  ;;  %496 = vst.msk [vmem:[#allocation2 + $0x30] sm:$0xff] %vm489_vm2, %v321_v18  ;;  %v71_v21 = vld [vmem:[%s6373_s0 + $0x78] sm:$0xff] }
  0xf5   :  { %v451_v24 = vadd.f32 %v5555_v41, %v450_v23  ;;  %4191 = vmatmul.mubr.msk.f32.gmra.mrb[14].mxu0 %vm103_vm0, %v71_v21  ;;  %v336_v23 = vadd.f32 %v4183_v20, %v5555_v41 }
  0xf6   :  { %523 = vst.msk [vmem:[#allocation2 + $0x108] sm:$0xff] %vm489_vm2, %v456_v22  ;;  %v330_v22 = vpop.f32.mrb[9].mxu0 }
  0xf7   :  { %522 = vst.msk [vmem:[#allocation2 + $0x100] sm:$0xff] %vm489_vm2, %v451_v24  ;;  %v4222_v25 = vpop.f32.mrb[14].mxu1  ;;  %v331_v24 = vadd.f32 %v5555_v41, %v330_v22  ;;  %499 = vst.msk [vmem:[#allocation2 + $0x48] sm:$0xff] %vm489_vm2, %v336_v23 }
  0xf8   :  { %v466_v26 = vadd.f32 %v4222_v25, %v5555_v41  ;;  %v460_v27 = vpop.f32.mrb[15].mxu1  ;;  %v72_v25 = vld [vmem:[%s6373_s0 + $0x80] sm:$0xff] }
  0xf9   :  { %v461_v28 = vadd.f32 %v5555_v41, %v460_v27  ;;  %498 = vst.msk [vmem:[#allocation2 + $0x40] sm:$0xff] %vm489_vm2, %v331_v24  ;;  %4193 = vmatprep.mubr.msk.f32.mxu0 %vm103_vm0, %v72_v25  ;;  %v74_v27 = vld [vmem:[%s6373_s0 + $0x90] sm:$0xff] }
  0xfa   :  { %525 = vst.msk [vmem:[#allocation2 + $0x118] sm:$0xff] %vm489_vm2, %v466_v26  ;;  %v73_v26 = vld [vmem:[%s6373_s0 + $0x88] sm:$0xff] }
  0xfb   :  { %524 = vst.msk [vmem:[#allocation2 + $0x110] sm:$0xff] %vm489_vm2, %v461_v28  ;;  %v4225_v29 = vpop.f32.mrb[16].mxu1  ;;  %4194 = vmatmul.mubr.msk.f32.gmra.mrb[16].mxu0 %vm103_vm0, %v73_v26  ;;  %v75_v28 = vld [vmem:[%s6373_s0 + $0x98] sm:$0xff] }
  0xfc   :  { %v476_v30 = vadd.f32 %v4225_v29, %v5555_v41  ;;  %v470_v31 = vpop.f32.mrb[17].mxu1  ;;  %4196 = vmatprep.mubr.msk.f32.mxu0 %vm103_vm0, %v74_v27  ;;  %v4186_v29 = vpop.f32.mrb[10].mxu0 }
  0xfd   :  { %v471_v32 = vadd.f32 %v5555_v41, %v470_v31  ;;  %v340_v31 = vpop.f32.mrb[11].mxu0 }
  0xfe   :  { %527 = vst.msk [vmem:[#allocation2 + $0x128] sm:$0xff] %vm489_vm2, %v476_v30  ;;  %v346_v30 = vadd.f32 %v4186_v29, %v5555_v41  ;;  %v642_v57 = vld [vmem:[#allocation2 + $0x48] sm:$0xff] }
  0xff   :  { %526 = vst.msk [vmem:[#allocation2 + $0x120] sm:$0xff] %vm489_vm2, %v471_v32  ;;  %v4228_v33 = vpop.f32.mrb[18].mxu1  ;;  %4197 = vmatmul.mubr.msk.f32.gmra.mrb[18].mxu0 %vm103_vm0, %v75_v28  ;;  %v341_v32 = vadd.f32 %v5555_v41, %v340_v31 }
 0x100   :  { %v486_v34 = vadd.f32 %v4228_v33, %v5555_v41  ;;  %v480_v35 = vpop.f32.mrb[19].mxu1  ;;  %4329 = vmatprep.mubr.msk.f32.mxu0 %vm5319_vm1, %v5320_v36  ;;  %501 = vst.msk [vmem:[#allocation2 + $0x58] sm:$0xff] %vm489_vm2, %v346_v30  ;;  %v4189_v33 = vpop.f32.mrb[12].mxu0 }
 0x101   :  { %v481_v37 = vadd.f32 %v5555_v41, %v480_v35  ;;  %500 = vst.msk [vmem:[#allocation2 + $0x50] sm:$0xff] %vm489_vm2, %v341_v32  ;;  %v350_v35 = vpop.f32.mrb[13].mxu0 }
 0x102   :  { %529 = vst.msk [vmem:[#allocation2 + $0x138] sm:$0xff] %vm489_vm2, %v486_v34  ;;  %v356_v34 = vadd.f32 %v4189_v33, %v5555_v41 }
 0x103   :  { %528 = vst.msk [vmem:[#allocation2 + $0x130] sm:$0xff] %vm489_vm2, %v481_v37  ;;  %v604_v39 = vpop.f32.mrb[20].mxu1  ;;  %v351_v37 = vadd.f32 %v5555_v41, %v350_v35 }
 0x104   :  { %v628_v40 = vadd.f32 %v604_v39, %v530_v38  ;;  %v4239_v42 = vpop.f32.mrb[21].mxu1  ;;  %503 = vst.msk [vmem:[#allocation2 + $0x68] sm:$0xff] %vm489_vm2, %v356_v34  ;;  %v638_v38 = vld [vmem:[#allocation2 + $0x28] sm:$0xff] }
 0x105   :  { %502 = vst.msk [vmem:[#allocation2 + $0x60] sm:$0xff] %vm489_vm2, %v351_v37 }
 0x106   :  { %5133 = vtanh.f32 %v628_v40 }
 0x107   :  { %v609_v44 = vpop.f32.mrb[22].mxu1 }
 0x108   :  { %v629_v45 = vadd.f32 %v609_v44, %v531_v43  ;;  %v4242_v46 = vpop.f32.mrb[23].mxu1  ;;  %v639_v43 = vld [vmem:[#allocation2 + $0x30] sm:$0xff] }
 0x10a   :  { %5135 = vtanh.f32 %v629_v45 }
 0x10b   :  { %v614_v48 = vpop.f32.mrb[24].mxu1 }
 0x10c   :  { %v630_v51 = vadd.f32 %v614_v48, %v532_v47  ;;  %v4245_v52 = vpop.f32.mrb[25].mxu1  ;;  %v640_v47 = vld [vmem:[#allocation2 + $0x38] sm:$0xff] }
 0x10e   :  { %5137 = vtanh.f32 %v630_v51  ;;  %v641_v51 = vld [vmem:[#allocation2 + $0x40] sm:$0xff] }
 0x10f   :  { %v619_v55 = vpop.f32.mrb[26].mxu1 }
 0x110   :  { %v5134_v58 = vpop.eup %5133  ;;  %v631_v59 = vadd.f32 %v619_v55, %v533_v54  ;;  %v4248_v60 = vpop.f32.mrb[27].mxu1 }
 0x111   :  { %4261 = vmatmul.mubr.msk.f32.vlgmr.msra.gmra.mrb[30].mxu1 %vm489_vm2, %v5134_v58 }
 0x112   :  { %5139 = vtanh.f32 %v631_v59  ;;  %4867 = vmatpush3.bf16.msra.mxu1 %v5631_v53  ;;  %4263 = vmatprep.mubr.msk.f32.mxu1 %vm5319_vm1, %v5320_v36 }
 0x113   :  { %v624_v63 = vpop.f32.mrb[28].mxu1  ;;  %4868 = vmatprep.subr.bf16.mxu1 %v5318_v8 }
 0x114   :  { %v5136_v0 = vpop.eup %5135  ;;  %v632_v1 = vadd.f32 %v624_v63, %v534_v61  ;;  %v4251_v2 = vpop.f32.mrb[29].mxu1 }
 0x115   :  { %4264 = vmatmul.mubr.msk.f32.gmra.mrb[32].mxu1 %vm489_vm2, %v5136_v0  ;;  %v5797_v2 = vld [vmem:[%s6379_s6] ss:$0 sm:$0xff] }
 0x116   :  { %5141 = vtanh.f32 %v632_v1  ;;  %4266 = vmatprep.mubr.msk.f32.mxu1 %vm5319_vm1, %v5320_v36  ;;  %4870 = vmatpush3.bf16.msra.mxu1 %v5643_v62 }
 0x117   :  { %4871 = vmatprep.subr.bf16.mxu1 %v5318_v8 }
 0x118   :  { %v5138_v3 = vpop.eup %5137 }
 0x119   :  { %4267 = vmatmul.mubr.msk.f32.gmra.mrb[34].mxu1 %vm489_vm2, %v5138_v3 }
 0x11a   :  { %4269 = vmatprep.mubr.msk.f32.mxu1 %vm5319_vm1, %v5320_v36 }
 0x11c   :  { %v5140_v4 = vpop.eup %5139 }
 0x11d   :  { %4270 = vmatmul.mubr.msk.f32.gmra.mrb[36].mxu1 %vm489_vm2, %v5140_v4 }
 0x11e   :  { %4272 = vmatprep.mubr.msk.f32.mxu1 %vm5319_vm1, %v5320_v36 }
 0x120   :  { %v5142_v9 = vpop.eup %5141 }
 0x121   :  { %4273 = vmatmul.mubr.msk.f32.gmra.mrb[38].mxu1 %vm489_vm2, %v5142_v9 }
 0x122   :  { %4283 = vmatprep.mubr.msk.f32.mxu1 %vm5319_vm1, %v5320_v36 }
 0x125   :  { %4284 = vmatmul.mubr.msk.f32.vlgmr.msra.gmra.mrb[40].mxu1 %vm489_vm2, %v5134_v58 }
 0x126   :  { %4873 = vmatpush3.bf16.msra.mxu1 %v5666_v10  ;;  %4286 = vmatprep.mubr.msk.f32.mxu1 %vm5319_vm1, %v5320_v36 }
 0x127   :  { %4874 = vmatprep.subr.bf16.mxu1 %v5318_v8 }
 0x129   :  { %4287 = vmatmul.mubr.msk.f32.gmra.mrb[42].mxu1 %vm489_vm2, %v5136_v0 }
 0x12a   :  { %4289 = vmatprep.mubr.msk.f32.mxu1 %vm5319_vm1, %v5320_v36  ;;  %4876 = vmatpush3.bf16.msra.mxu1 %v5678_v13 }
 0x12b   :  { %4883 = vmatprep.subr.bf16.mxu1 %v5318_v8 }
 0x12d   :  { %4290 = vmatmul.mubr.msk.f32.gmra.mrb[44].mxu1 %vm489_vm2, %v5138_v3 }
 0x12e   :  { %4292 = vmatprep.mubr.msk.f32.mxu1 %vm5319_vm1, %v5320_v36 }
 0x131   :  { %4293 = vmatmul.mubr.msk.f32.gmra.mrb[46].mxu1 %vm489_vm2, %v5140_v4 }
 0x132   :  { %4295 = vmatprep.mubr.msk.f32.mxu1 %vm5319_vm1, %v5320_v36 }
 0x135   :  { %4296 = vmatmul.mubr.msk.f32.gmra.mrb[48].mxu1 %vm489_vm2, %v5142_v9 }
 0x136   :  { %4306 = vmatprep.mubr.msk.f32.mxu1 %vm5319_vm1, %v5320_v36 }
 0x139   :  { %4307 = vmatmul.mubr.f32.vlgmr.msra.gmra.mrb[40].mxu1 %v5320_v36 }
 0x13a   :  { %4309 = vmatprep.mubr.msk.f32.mxu1 %vm5319_vm1, %v5320_v36  ;;  %4885 = vmatpush3.bf16.msra.mxu1 %v5631_v53 }
 0x13b   :  { %4886 = vmatprep.subr.bf16.mxu1 %v5318_v8 }
 0x13d   :  { %4310 = vmatmul.mubr.f32.gmra.mrb[42].mxu1 %v5320_v36 }
 0x13e   :  { %4312 = vmatprep.mubr.msk.f32.mxu1 %vm5319_vm1, %v5320_v36  ;;  %4888 = vmatpush3.bf16.msra.mxu1 %v5643_v62 }
 0x13f   :  { %4889 = vmatprep.subr.bf16.mxu1 %v5318_v8 }
 0x141   :  { %4313 = vmatmul.mubr.f32.gmra.mrb[44].mxu1 %v5320_v36 }
 0x142   :  { %4315 = vmatprep.mubr.msk.f32.mxu1 %vm5319_vm1, %v5320_v36 }
 0x145   :  { %4316 = vmatmul.mubr.f32.gmra.mrb[46].mxu1 %v5320_v36 }
 0x146   :  { %4318 = vmatprep.mubr.msk.f32.mxu1 %vm5319_vm1, %v5320_v36 }
 0x149   :  { %4319 = vmatmul.mubr.f32.gmra.mrb[48].mxu1 %v5320_v36 }
 0x14a   :  { %4352 = vmatprep.mubr.msk.f32.mxu1 %vm5319_vm1, %v5320_v36 }
 0x1c8   :  { %v4192_v28 = vpop.f32.mrb[14].mxu0 }
 0x1c9   :  { %v366_v29 = vadd.f32 %v4192_v28, %v5555_v41  ;;  %v360_v30 = vpop.f32.mrb[15].mxu0 }
 0x1ca   :  { %v361_v31 = vadd.f32 %v5555_v41, %v360_v30 }
 0x1cb   :  { %505 = vst.msk [vmem:[#allocation2 + $0x78] sm:$0xff] %vm489_vm2, %v366_v29 }
 0x1cc   :  { %504 = vst.msk [vmem:[#allocation2 + $0x70] sm:$0xff] %vm489_vm2, %v361_v31 }
 0x1ce   :  { %v4195_v32 = vpop.f32.mrb[16].mxu0 }
 0x1cf   :  { %v376_v33 = vadd.f32 %v4195_v32, %v5555_v41  ;;  %v370_v34 = vpop.f32.mrb[17].mxu0 }
 0x1d0   :  { %v371_v35 = vadd.f32 %v5555_v41, %v370_v34 }
 0x1d1   :  { %507 = vst.msk [vmem:[#allocation2 + $0x88] sm:$0xff] %vm489_vm2, %v376_v33 }
 0x1d2   :  { %506 = vst.msk [vmem:[#allocation2 + $0x80] sm:$0xff] %vm489_vm2, %v371_v35  ;;  %v4198_v37 = vpop.f32.mrb[18].mxu0  ;;  %v1283_v30 = vld [vmem:[#allocation2 + $0x78] sm:$0xff] }
 0x1d9   :  { %v1284_v34 = vld [vmem:[#allocation2 + $0x80] sm:$0xff] }
 0x1e4   :  { %v724_v39 = vpop.f32.mrb[30].mxu1 }
 0x1e5   :  { %v748_v40 = vadd.f32 %v724_v39, %v638_v38  ;;  %v4262_v42 = vpop.f32.mrb[31].mxu1  ;;  %v386_v38 = vadd.f32 %v4198_v37, %v5555_v41  ;;  %v380_v39 = vpop.f32.mrb[19].mxu0 }
 0x1e6   :  { %v953_v42 = vld [vmem:[#allocation2 + $0x50] sm:$0xff] }
 0x1e7   :  { %5143 = vtanh.f32 %v748_v40  ;;  %v381_v40 = vadd.f32 %v5555_v41, %v380_v39  ;;  %509 = vst.msk [vmem:[#allocation2 + $0x98] sm:$0xff] %vm489_vm2, %v386_v38  ;;  %v956_v41 = vld [vmem:[#allocation2 + $0x68] sm:$0xff] }
 0x1e8   :  { %v729_v44 = vpop.f32.mrb[32].mxu1  ;;  %v1285_v39 = vld [vmem:[#allocation2 + $0x88] sm:$0xff] }
 0x1e9   :  { %v749_v45 = vadd.f32 %v729_v44, %v639_v43  ;;  %v4265_v46 = vpop.f32.mrb[33].mxu1  ;;  %508 = vst.msk [vmem:[#allocation2 + $0x90] sm:$0xff] %vm489_vm2, %v381_v40 }
 0x1ea   :  { %v954_v46 = vld [vmem:[#allocation2 + $0x58] sm:$0xff] }
 0x1eb   :  { %5145 = vtanh.f32 %v749_v45 }
 0x1ec   :  { %v734_v48 = vpop.f32.mrb[34].mxu1 }
 0x1ed   :  { %v750_v49 = vadd.f32 %v734_v48, %v640_v47  ;;  %v4268_v50 = vpop.f32.mrb[35].mxu1 }
 0x1ee   :  { %v955_v50 = vld [vmem:[#allocation2 + $0x60] sm:$0xff] }
 0x1ef   :  { %5147 = vtanh.f32 %v750_v49 }
 0x1f0   :  { %v739_v52 = vpop.f32.mrb[36].mxu1 }
 0x1f1   :  { %v5144_v54 = vpop.eup %5143  ;;  %v751_v55 = vadd.f32 %v739_v52, %v641_v51  ;;  %v4271_v56 = vpop.f32.mrb[37].mxu1 }
 0x1f2   :  { %4330 = vmatmul.mubr.msk.f32.vlgmr.msra.gmra.mrb[20].mxu0 %vm489_vm2, %v5144_v54  ;;  %4353 = vmatmul.mubr.msk.f32.vlgmr.msra.gmra.mrb[50].mxu1 %vm489_vm2, %v5144_v54 }
 0x1f3   :  { %5149 = vtanh.f32 %v751_v55  ;;  %4332 = vmatprep.mubr.msk.f32.mxu0 %vm5319_vm1, %v5320_v36  ;;  %4355 = vmatprep.mubr.msk.f32.mxu1 %vm5319_vm1, %v5320_v36 }
 0x1f4   :  { %v744_v58 = vpop.f32.mrb[38].mxu1  ;;  %4891 = vmatpush3.bf16.msra.mxu1 %v5666_v10  ;;  %4897 = vmatpush3.bf16.msra.mxu0 %v5398_v7 }
 0x1f5   :  { %v5146_v59 = vpop.eup %5145  ;;  %v752_v60 = vadd.f32 %v744_v58, %v642_v57  ;;  %v4274_v61 = vpop.f32.mrb[39].mxu1  ;;  %4892 = vmatprep.subr.bf16.mxu1 %v5318_v8  ;;  %4898 = vmatprep.subr.bf16.mxu0 %v5318_v8 }
 0x1f6   :  { %4333 = vmatmul.mubr.msk.f32.gmra.mrb[22].mxu0 %vm489_vm2, %v5146_v59  ;;  %4356 = vmatmul.mubr.msk.f32.gmra.mrb[52].mxu1 %vm489_vm2, %v5146_v59  ;;  %v957_v59 = vld [vmem:[#allocation2 + $0x70] sm:$0xff] }
 0x1f7   :  { %5151 = vtanh.f32 %v752_v60  ;;  %4335 = vmatprep.mubr.msk.f32.mxu0 %vm5319_vm1, %v5320_v36  ;;  %4358 = vmatprep.mubr.msk.f32.mxu1 %vm5319_vm1, %v5320_v36 }
 0x1f8   :  { %4894 = vmatpush3.bf16.msra.mxu1 %v5678_v13  ;;  %4900 = vmatpush3.bf16.msra.mxu0 %v5423_v15 }
 0x1f9   :  { %v5148_v63 = vpop.eup %5147  ;;  %4901 = vmatprep.subr.bf16.mxu0 %v5318_v8  ;;  %4913 = vmatprep.subr.bf16.mxu1 %v5318_v8 }
 0x1fa   :  { %4336 = vmatmul.mubr.msk.f32.gmra.mrb[24].mxu0 %vm489_vm2, %v5148_v63  ;;  %4359 = vmatmul.mubr.msk.f32.gmra.mrb[54].mxu1 %vm489_vm2, %v5148_v63 }
 0x1fb   :  { %4338 = vmatprep.mubr.msk.f32.mxu0 %vm5319_vm1, %v5320_v36  ;;  %4361 = vmatprep.mubr.msk.f32.mxu1 %vm5319_vm1, %v5320_v36 }
 0x1fd   :  { %v5150_v0 = vpop.eup %5149 }
 0x1fe   :  { %4339 = vmatmul.mubr.msk.f32.gmra.mrb[26].mxu0 %vm489_vm2, %v5150_v0  ;;  %4362 = vmatmul.mubr.msk.f32.gmra.mrb[56].mxu1 %vm489_vm2, %v5150_v0 }
 0x1ff   :  { %4341 = vmatprep.mubr.msk.f32.mxu0 %vm5319_vm1, %v5320_v36  ;;  %4364 = vmatprep.mubr.msk.f32.mxu1 %vm5319_vm1, %v5320_v36 }
 0x201   :  { %v5152_v1 = vpop.eup %5151 }
 0x202   :  { %4342 = vmatmul.mubr.msk.f32.gmra.mrb[28].mxu0 %vm489_vm2, %v5152_v1  ;;  %4365 = vmatmul.mubr.msk.f32.gmra.mrb[58].mxu1 %vm489_vm2, %v5152_v1 }
 0x203   :  { %4375 = vmatprep.mubr.msk.f32.mxu1 %vm5319_vm1, %v5320_v36  ;;  %4398 = vmatprep.mubr.msk.f32.mxu0 %vm5319_vm1, %v5320_v36 }
 0x20c   :  { %v914_v3 = vpop.f32.mrb[40].mxu1 }
 0x20d   :  { %v5007_v4 = vadd.f32 %v5797_v2, %v914_v3  ;;  %v4308_v5 = vpop.f32.mrb[41].mxu1 }
 0x20f   :  { %5153 = vtanh.f32 %v5007_v4 }
 0x210   :  { %v919_v6 = vpop.f32.mrb[42].mxu1 }
 0x211   :  { %v5008_v9 = vadd.f32 %v5797_v2, %v919_v6  ;;  %v4311_v11 = vpop.f32.mrb[43].mxu1 }
 0x213   :  { %5155 = vtanh.f32 %v5008_v9 }
 0x214   :  { %v924_v12 = vpop.f32.mrb[44].mxu1 }
 0x215   :  { %v5009_v14 = vadd.f32 %v5797_v2, %v924_v12  ;;  %v4314_v16 = vpop.f32.mrb[45].mxu1 }
 0x217   :  { %5157 = vtanh.f32 %v5009_v14 }
 0x218   :  { %v929_v17 = vpop.f32.mrb[46].mxu1 }
 0x219   :  { %v5154_v18 = vpop.eup %5153  ;;  %v5010_v19 = vadd.f32 %v5797_v2, %v929_v17  ;;  %v4317_v20 = vpop.f32.mrb[47].mxu1 }
 0x21a   :  { %948 = vst.msk [vmem:[#allocation3] sm:$0xff] %vm489_vm2, %v5154_v18  ;;  %4376 = vmatmul.mubr.msk.f32.vlgmr.msra.gmra.mrb[50].mxu1 %vm489_vm2, %v5154_v18 }
 0x21b   :  { %5159 = vtanh.f32 %v5010_v19  ;;  %4378 = vmatprep.mubr.msk.f32.mxu1 %vm5319_vm1, %v5320_v36  ;;  %4915 = vmatpush3.bf16.msra.mxu1 %v5398_v7 }
 0x21c   :  { %v934_v21 = vpop.f32.mrb[48].mxu1  ;;  %4916 = vmatprep.subr.bf16.mxu1 %v5318_v8 }
 0x21d   :  { %v5156_v22 = vpop.eup %5155  ;;  %v5011_v23 = vadd.f32 %v5797_v2, %v934_v21  ;;  %v4320_v24 = vpop.f32.mrb[49].mxu1 }
 0x21e   :  { %949 = vst.msk [vmem:[#allocation3 + $0x8] sm:$0xff] %vm489_vm2, %v5156_v22  ;;  %4379 = vmatmul.mubr.msk.f32.gmra.mrb[52].mxu1 %vm489_vm2, %v5156_v22 }
 0x21f   :  { %5161 = vtanh.f32 %v5011_v23  ;;  %4381 = vmatprep.mubr.msk.f32.mxu1 %vm5319_vm1, %v5320_v36  ;;  %4918 = vmatpush3.bf16.msra.mxu1 %v5423_v15 }
 0x220   :  { %4919 = vmatprep.subr.bf16.mxu1 %v5318_v8 }
 0x221   :  { %v5158_v25 = vpop.eup %5157 }
 0x222   :  { %950 = vst.msk [vmem:[#allocation3 + $0x10] sm:$0xff] %vm489_vm2, %v5158_v25  ;;  %4382 = vmatmul.mubr.msk.f32.gmra.mrb[54].mxu1 %vm489_vm2, %v5158_v25 }
 0x223   :  { %4384 = vmatprep.mubr.msk.f32.mxu1 %vm5319_vm1, %v5320_v36 }
 0x225   :  { %v5160_v26 = vpop.eup %5159 }
 0x226   :  { %951 = vst.msk [vmem:[#allocation3 + $0x18] sm:$0xff] %vm489_vm2, %v5160_v26  ;;  %4385 = vmatmul.mubr.msk.f32.gmra.mrb[56].mxu1 %vm489_vm2, %v5160_v26 }
 0x227   :  { %4387 = vmatprep.mubr.msk.f32.mxu1 %vm5319_vm1, %v5320_v36 }
 0x229   :  { %v5162_v27 = vpop.eup %5161 }
 0x22a   :  { %952 = vst.msk [vmem:[#allocation3 + $0x20] sm:$0xff] %vm489_vm2, %v5162_v27  ;;  %4388 = vmatmul.mubr.msk.f32.gmra.mrb[58].mxu1 %vm489_vm2, %v5162_v27 }
 0x22b   :  { %4467 = vmatprep.mubr.msk.f32.mxu1 %vm5319_vm1, %v5320_v36 }
 0x2c5   :  { %v1039_v43 = vpop.f32.mrb[20].mxu0 }
 0x2c6   :  { %v1063_v44 = vadd.f32 %v1039_v43, %v953_v42  ;;  %v4331_v45 = vpop.f32.mrb[21].mxu0 }
 0x2c8   :  { %5163 = vtanh.f32 %v1063_v44  ;;  %v1286_v44 = vld [vmem:[#allocation2 + $0x90] sm:$0xff] }
 0x2c9   :  { %v1044_v47 = vpop.f32.mrb[22].mxu0 }
 0x2ca   :  { %v1064_v48 = vadd.f32 %v1044_v47, %v954_v46  ;;  %v4334_v49 = vpop.f32.mrb[23].mxu0 }
 0x2cb   :  { %v1287_v49 = vld [vmem:[#allocation2 + $0x98] sm:$0xff] }
 0x2cc   :  { %5165 = vtanh.f32 %v1064_v48 }
 0x2cd   :  { %v1049_v51 = vpop.f32.mrb[24].mxu0 }
 0x2ce   :  { %v1065_v52 = vadd.f32 %v1049_v51, %v955_v50  ;;  %v4337_v54 = vpop.f32.mrb[25].mxu0 }
 0x2d0   :  { %5167 = vtanh.f32 %v1065_v52 }
 0x2d1   :  { %v1054_v55 = vpop.f32.mrb[26].mxu0 }
 0x2d2   :  { %v5164_v56 = vpop.eup %5163  ;;  %v1066_v57 = vadd.f32 %v1054_v55, %v956_v41  ;;  %v4340_v58 = vpop.f32.mrb[27].mxu0 }
 0x2d3   :  { %4399 = vmatmul.mubr.msk.f32.vlgmr.msra.gmra.mrb[30].mxu0 %vm489_vm2, %v5164_v56 }
 0x2d4   :  { %5169 = vtanh.f32 %v1066_v57  ;;  %4903 = vmatpush3.bf16.msra.mxu0 %v5631_v53  ;;  %4401 = vmatprep.mubr.msk.f32.mxu0 %vm5319_vm1, %v5320_v36 }
 0x2d5   :  { %v1059_v60 = vpop.f32.mrb[28].mxu0  ;;  %4904 = vmatprep.subr.bf16.mxu0 %v5318_v8 }
 0x2d6   :  { %v5166_v61 = vpop.eup %5165  ;;  %v1067_v63 = vadd.f32 %v1059_v60, %v957_v59  ;;  %v4343_v0 = vpop.f32.mrb[29].mxu0 }
 0x2d7   :  { %4402 = vmatmul.mubr.msk.f32.gmra.mrb[32].mxu0 %vm489_vm2, %v5166_v61 }
 0x2d8   :  { %5171 = vtanh.f32 %v1067_v63  ;;  %4404 = vmatprep.mubr.msk.f32.mxu0 %vm5319_vm1, %v5320_v36  ;;  %4906 = vmatpush3.bf16.msra.mxu0 %v5643_v62 }
 0x2d9   :  { %4907 = vmatprep.subr.bf16.mxu0 %v5318_v8 }
 0x2da   :  { %v5168_v1 = vpop.eup %5167 }
 0x2db   :  { %4405 = vmatmul.mubr.msk.f32.gmra.mrb[34].mxu0 %vm489_vm2, %v5168_v1 }
 0x2dc   :  { %4407 = vmatprep.mubr.msk.f32.mxu0 %vm5319_vm1, %v5320_v36 }
 0x2de   :  { %v5170_v3 = vpop.eup %5169 }
 0x2df   :  { %4408 = vmatmul.mubr.msk.f32.gmra.mrb[36].mxu0 %vm489_vm2, %v5170_v3 }
 0x2e0   :  { %4410 = vmatprep.mubr.msk.f32.mxu0 %vm5319_vm1, %v5320_v36 }
 0x2e2   :  { %v5172_v4 = vpop.eup %5171 }
 0x2e3   :  { %4411 = vmatmul.mubr.msk.f32.gmra.mrb[38].mxu0 %vm489_vm2, %v5172_v4 }
 0x2e4   :  { %4421 = vmatprep.mubr.msk.f32.mxu0 %vm5319_vm1, %v5320_v36 }
 0x2e7   :  { %4422 = vmatmul.mubr.msk.f32.vlgmr.msra.gmra.mrb[40].mxu0 %vm489_vm2, %v5164_v56 }
 0x2e8   :  { %4909 = vmatpush3.bf16.msra.mxu0 %v5666_v10  ;;  %4424 = vmatprep.mubr.msk.f32.mxu0 %vm5319_vm1, %v5320_v36 }
 0x2e9   :  { %4910 = vmatprep.subr.bf16.mxu0 %v5318_v8 }
 0x2eb   :  { %4425 = vmatmul.mubr.msk.f32.gmra.mrb[42].mxu0 %vm489_vm2, %v5166_v61 }
 0x2ec   :  { %4427 = vmatprep.mubr.msk.f32.mxu0 %vm5319_vm1, %v5320_v36  ;;  %4912 = vmatpush3.bf16.msra.mxu0 %v5678_v13 }
 0x2ed   :  { %v1244_v5 = vpop.f32.mrb[50].mxu1  ;;  %4931 = vmatprep.subr.bf16.mxu0 %v5318_v8 }
 0x2ee   :  { %v5012_v6 = vadd.f32 %v5797_v2, %v1244_v5  ;;  %v4377_v9 = vpop.f32.mrb[51].mxu1 }
 0x2ef   :  { %4428 = vmatmul.mubr.msk.f32.gmra.mrb[44].mxu0 %vm489_vm2, %v5168_v1 }
 0x2f0   :  { %5173 = vtanh.f32 %v5012_v6  ;;  %4430 = vmatprep.mubr.msk.f32.mxu0 %vm5319_vm1, %v5320_v36 }
 0x2f1   :  { %v1249_v11 = vpop.f32.mrb[52].mxu1 }
 0x2f2   :  { %v5013_v12 = vadd.f32 %v5797_v2, %v1249_v11  ;;  %v4380_v14 = vpop.f32.mrb[53].mxu1 }
 0x2f3   :  { %4431 = vmatmul.mubr.msk.f32.gmra.mrb[46].mxu0 %vm489_vm2, %v5170_v3 }
 0x2f4   :  { %5175 = vtanh.f32 %v5013_v12  ;;  %4433 = vmatprep.mubr.msk.f32.mxu0 %vm5319_vm1, %v5320_v36 }
 0x2f5   :  { %v1254_v16 = vpop.f32.mrb[54].mxu1 }
 0x2f6   :  { %v5014_v17 = vadd.f32 %v5797_v2, %v1254_v16  ;;  %v4383_v18 = vpop.f32.mrb[55].mxu1 }
 0x2f7   :  { %4434 = vmatmul.mubr.msk.f32.gmra.mrb[48].mxu0 %vm489_vm2, %v5172_v4 }
 0x2f8   :  { %5177 = vtanh.f32 %v5014_v17  ;;  %4444 = vmatprep.mubr.msk.f32.mxu0 %vm5319_vm1, %v5320_v36 }
 0x2f9   :  { %v1259_v19 = vpop.f32.mrb[56].mxu1 }
 0x2fa   :  { %v5174_v20 = vpop.eup %5173  ;;  %v5015_v21 = vadd.f32 %v5797_v2, %v1259_v19  ;;  %v4386_v22 = vpop.f32.mrb[57].mxu1 }
 0x2fb   :  { %1278 = vst.msk [vmem:[#allocation3 + $0x28] sm:$0xff] %vm489_vm2, %v5174_v20  ;;  %4445 = vmatmul.mubr.msk.f32.vlgmr.msra.gmra.mrb[40].mxu0 %vm489_vm2, %v5174_v20  ;;  %v1613_v20 = vld [vmem:[#allocation2 + $0xa0] sm:$0xff] }
 0x2fc   :  { %5179 = vtanh.f32 %v5015_v21  ;;  %4447 = vmatprep.mubr.msk.f32.mxu0 %vm5319_vm1, %v5320_v36  ;;  %4933 = vmatpush3.bf16.msra.mxu0 %v5398_v7 }
 0x2fd   :  { %v1264_v23 = vpop.f32.mrb[58].mxu1  ;;  %4934 = vmatprep.subr.bf16.mxu0 %v5318_v8 }
 0x2fe   :  { %v5176_v24 = vpop.eup %5175  ;;  %v5016_v25 = vadd.f32 %v5797_v2, %v1264_v23  ;;  %v4389_v26 = vpop.f32.mrb[59].mxu1 }
 0x2ff   :  { %1279 = vst.msk [vmem:[#allocation3 + $0x30] sm:$0xff] %vm489_vm2, %v5176_v24  ;;  %4448 = vmatmul.mubr.msk.f32.gmra.mrb[42].mxu0 %vm489_vm2, %v5176_v24  ;;  %v1614_v24 = vld [vmem:[#allocation2 + $0xa8] sm:$0xff] }
 0x300   :  { %5181 = vtanh.f32 %v5016_v25  ;;  %4450 = vmatprep.mubr.msk.f32.mxu0 %vm5319_vm1, %v5320_v36  ;;  %4936 = vmatpush3.bf16.msra.mxu0 %v5423_v15 }
 0x301   :  { %4937 = vmatprep.subr.bf16.mxu0 %v5318_v8 }
 0x302   :  { %v5178_v27 = vpop.eup %5177 }
 0x303   :  { %1280 = vst.msk [vmem:[#allocation3 + $0x38] sm:$0xff] %vm489_vm2, %v5178_v27  ;;  %4451 = vmatmul.mubr.msk.f32.gmra.mrb[44].mxu0 %vm489_vm2, %v5178_v27 }
 0x304   :  { %4453 = vmatprep.mubr.msk.f32.mxu0 %vm5319_vm1, %v5320_v36 }
 0x306   :  { %v5180_v28 = vpop.eup %5179 }
 0x307   :  { %1281 = vst.msk [vmem:[#allocation3 + $0x40] sm:$0xff] %vm489_vm2, %v5180_v28  ;;  %4454 = vmatmul.mubr.msk.f32.gmra.mrb[46].mxu0 %vm489_vm2, %v5180_v28  ;;  %v1615_v28 = vld [vmem:[#allocation2 + $0xb0] sm:$0xff] }
 0x308   :  { %4456 = vmatprep.mubr.msk.f32.mxu0 %vm5319_vm1, %v5320_v36 }
 0x30a   :  { %v5182_v29 = vpop.eup %5181 }
 0x30b   :  { %1282 = vst.msk [vmem:[#allocation3 + $0x48] sm:$0xff] %vm489_vm2, %v5182_v29  ;;  %4457 = vmatmul.mubr.msk.f32.gmra.mrb[48].mxu0 %vm489_vm2, %v5182_v29 }
 0x30c   :  { %4536 = vmatprep.mubr.msk.f32.mxu0 %vm5319_vm1, %v5320_v36 }
 0x3a6   :  { %v1369_v31 = vpop.f32.mrb[30].mxu0 }
 0x3a7   :  { %v1393_v32 = vadd.f32 %v1369_v31, %v1283_v30  ;;  %v4400_v33 = vpop.f32.mrb[31].mxu0 }
 0x3a9   :  { %5183 = vtanh.f32 %v1393_v32  ;;  %v1616_v32 = vld [vmem:[#allocation2 + $0xb8] sm:$0xff] }
 0x3aa   :  { %v1374_v35 = vpop.f32.mrb[32].mxu0 }
 0x3ab   :  { %v1394_v37 = vadd.f32 %v1374_v35, %v1284_v34  ;;  %v4403_v38 = vpop.f32.mrb[33].mxu0 }
 0x3ac   :  { %v1617_v38 = vld [vmem:[#allocation2 + $0xc0] sm:$0xff] }
 0x3ad   :  { %5185 = vtanh.f32 %v1394_v37 }
 0x3ae   :  { %v1379_v40 = vpop.f32.mrb[34].mxu0 }
 0x3af   :  { %v1395_v42 = vadd.f32 %v1379_v40, %v1285_v39  ;;  %v4406_v43 = vpop.f32.mrb[35].mxu0 }
 0x3b1   :  { %5187 = vtanh.f32 %v1395_v42 }
 0x3b2   :  { %v1384_v45 = vpop.f32.mrb[36].mxu0 }
 0x3b3   :  { %v5184_v46 = vpop.eup %5183  ;;  %v1396_v47 = vadd.f32 %v1384_v45, %v1286_v44  ;;  %v4409_v48 = vpop.f32.mrb[37].mxu0 }
 0x3b4   :  { %4468 = vmatmul.mubr.msk.f32.vlgmr.msra.gmra.mrb[60].mxu1 %vm489_vm2, %v5184_v46 }
 0x3b5   :  { %5189 = vtanh.f32 %v1396_v47  ;;  %4921 = vmatpush3.bf16.msra.mxu1 %v5631_v53  ;;  %4470 = vmatprep.mubr.msk.f32.mxu1 %vm5319_vm1, %v5320_v36 }
 0x3b6   :  { %v1389_v50 = vpop.f32.mrb[38].mxu0  ;;  %4922 = vmatprep.subr.bf16.mxu1 %v5318_v8 }
 0x3b7   :  { %v5186_v51 = vpop.eup %5185  ;;  %v1397_v52 = vadd.f32 %v1389_v50, %v1287_v49  ;;  %v4412_v54 = vpop.f32.mrb[39].mxu0 }
 0x3b8   :  { %4471 = vmatmul.mubr.msk.f32.gmra.mrb[62].mxu1 %vm489_vm2, %v5186_v51 }
 0x3b9   :  { %5191 = vtanh.f32 %v1397_v52  ;;  %4473 = vmatprep.mubr.msk.f32.mxu1 %vm5319_vm1, %v5320_v36  ;;  %4924 = vmatpush3.bf16.msra.mxu1 %v5643_v62 }
 0x3ba   :  { %4925 = vmatprep.subr.bf16.mxu1 %v5318_v8 }
 0x3bb   :  { %v5188_v41 = vpop.eup %5187 }
 0x3bc   :  { %4474 = vmatmul.mubr.msk.f32.gmra.mrb[64].mxu1 %vm489_vm2, %v5188_v41 }
 0x3bd   :  { %4476 = vmatprep.mubr.msk.f32.mxu1 %vm5319_vm1, %v5320_v36 }
 0x3bf   :  { %v5190_v55 = vpop.eup %5189 }
 0x3c0   :  { %4477 = vmatmul.mubr.msk.f32.gmra.mrb[66].mxu1 %vm489_vm2, %v5190_v55 }
 0x3c1   :  { %4479 = vmatprep.mubr.msk.f32.mxu1 %vm5319_vm1, %v5320_v36 }
 0x3c3   :  { %v5192_v56 = vpop.eup %5191 }
 0x3c4   :  { %4480 = vmatmul.mubr.msk.f32.gmra.mrb[68].mxu1 %vm489_vm2, %v5192_v56 }
 0x3c5   :  { %4490 = vmatprep.mubr.msk.f32.mxu1 %vm5319_vm1, %v5320_v36 }
 0x3c8   :  { %4491 = vmatmul.mubr.msk.f32.vlgmr.msra.gmra.mrb[70].mxu1 %vm489_vm2, %v5184_v46 }
 0x3c9   :  { %4927 = vmatpush3.bf16.msra.mxu1 %v5666_v10  ;;  %4493 = vmatprep.mubr.msk.f32.mxu1 %vm5319_vm1, %v5320_v36 }
 0x3ca   :  { %4928 = vmatprep.subr.bf16.mxu1 %v5318_v8 }
 0x3cc   :  { %4494 = vmatmul.mubr.msk.f32.gmra.mrb[72].mxu1 %vm489_vm2, %v5186_v51 }
 0x3cd   :  { %4496 = vmatprep.mubr.msk.f32.mxu1 %vm5319_vm1, %v5320_v36  ;;  %4930 = vmatpush3.bf16.msra.mxu1 %v5678_v13 }
 0x3ce   :  { %v1574_v57 = vpop.f32.mrb[40].mxu0  ;;  %4949 = vmatprep.subr.bf16.mxu1 %v5318_v8 }
 0x3cf   :  { %v5017_v58 = vadd.f32 %v5797_v2, %v1574_v57  ;;  %v4446_v59 = vpop.f32.mrb[41].mxu0 }
 0x3d0   :  { %4497 = vmatmul.mubr.msk.f32.gmra.mrb[74].mxu1 %vm489_vm2, %v5188_v41 }
 0x3d1   :  { %5193 = vtanh.f32 %v5017_v58  ;;  %4499 = vmatprep.mubr.msk.f32.mxu1 %vm5319_vm1, %v5320_v36 }
 0x3d2   :  { %v1579_v60 = vpop.f32.mrb[42].mxu0 }
 0x3d3   :  { %v5018_v61 = vadd.f32 %v5797_v2, %v1579_v60  ;;  %v4449_v63 = vpop.f32.mrb[43].mxu0 }
 0x3d4   :  { %4500 = vmatmul.mubr.msk.f32.gmra.mrb[76].mxu1 %vm489_vm2, %v5190_v55 }
 0x3d5   :  { %5195 = vtanh.f32 %v5018_v61  ;;  %4502 = vmatprep.mubr.msk.f32.mxu1 %vm5319_vm1, %v5320_v36 }
 0x3d6   :  { %v1584_v0 = vpop.f32.mrb[44].mxu0 }
 0x3d7   :  { %v5019_v1 = vadd.f32 %v5797_v2, %v1584_v0  ;;  %v4452_v3 = vpop.f32.mrb[45].mxu0 }
 0x3d8   :  { %4503 = vmatmul.mubr.msk.f32.gmra.mrb[78].mxu1 %vm489_vm2, %v5192_v56 }
 0x3d9   :  { %5197 = vtanh.f32 %v5019_v1  ;;  %4513 = vmatprep.mubr.msk.f32.mxu1 %vm5319_vm1, %v5320_v36 }
 0x3da   :  { %v1589_v4 = vpop.f32.mrb[46].mxu0 }
 0x3db   :  { %v5194_v5 = vpop.eup %5193  ;;  %v5020_v6 = vadd.f32 %v5797_v2, %v1589_v4  ;;  %v4455_v9 = vpop.f32.mrb[47].mxu0 }
 0x3dc   :  { %1608 = vst.msk [vmem:[#allocation3 + $0x50] sm:$0xff] %vm489_vm2, %v5194_v5  ;;  %4514 = vmatmul.mubr.msk.f32.vlgmr.msra.gmra.mrb[70].mxu1 %vm489_vm2, %v5194_v5  ;;  %v1944_v9 = vld [vmem:[#allocation2 + $0xd0] sm:$0xff] }
 0x3dd   :  { %5199 = vtanh.f32 %v5020_v6  ;;  %4516 = vmatprep.mubr.msk.f32.mxu1 %vm5319_vm1, %v5320_v36  ;;  %4951 = vmatpush3.bf16.msra.mxu1 %v5398_v7 }
 0x3de   :  { %v1594_v11 = vpop.f32.mrb[48].mxu0  ;;  %4952 = vmatprep.subr.bf16.mxu1 %v5318_v8 }
 0x3df   :  { %v5196_v12 = vpop.eup %5195  ;;  %v5021_v14 = vadd.f32 %v5797_v2, %v1594_v11  ;;  %v4458_v16 = vpop.f32.mrb[49].mxu0 }
 0x3e0   :  { %1609 = vst.msk [vmem:[#allocation3 + $0x58] sm:$0xff] %vm489_vm2, %v5196_v12  ;;  %4517 = vmatmul.mubr.msk.f32.gmra.mrb[72].mxu1 %vm489_vm2, %v5196_v12  ;;  %v1945_v16 = vld [vmem:[#allocation2 + $0xd8] sm:$0xff] }
 0x3e1   :  { %5201 = vtanh.f32 %v5021_v14  ;;  %4519 = vmatprep.mubr.msk.f32.mxu1 %vm5319_vm1, %v5320_v36  ;;  %4954 = vmatpush3.bf16.msra.mxu1 %v5423_v15 }
 0x3e2   :  { %4955 = vmatprep.subr.bf16.mxu1 %v5318_v8 }
 0x3e3   :  { %v5198_v17 = vpop.eup %5197 }
 0x3e4   :  { %1610 = vst.msk [vmem:[#allocation3 + $0x60] sm:$0xff] %vm489_vm2, %v5198_v17  ;;  %4520 = vmatmul.mubr.msk.f32.gmra.mrb[74].mxu1 %vm489_vm2, %v5198_v17 }
 0x3e5   :  { %4522 = vmatprep.mubr.msk.f32.mxu1 %vm5319_vm1, %v5320_v36 }
 0x3e7   :  { %v5200_v18 = vpop.eup %5199 }
 0x3e8   :  { %1611 = vst.msk [vmem:[#allocation3 + $0x68] sm:$0xff] %vm489_vm2, %v5200_v18  ;;  %4523 = vmatmul.mubr.msk.f32.gmra.mrb[76].mxu1 %vm489_vm2, %v5200_v18 }
 0x3e9   :  { %4525 = vmatprep.mubr.msk.f32.mxu1 %vm5319_vm1, %v5320_v36 }
 0x3eb   :  { %v5202_v19 = vpop.eup %5201 }
 0x3ec   :  { %1612 = vst.msk [vmem:[#allocation3 + $0x70] sm:$0xff] %vm489_vm2, %v5202_v19  ;;  %4526 = vmatmul.mubr.msk.f32.gmra.mrb[78].mxu1 %vm489_vm2, %v5202_v19 }
 0x3ed   :  { %4605 = vmatprep.mubr.msk.f32.mxu1 %vm5319_vm1, %v5320_v36 }
 0x487   :  { %v1699_v21 = vpop.f32.mrb[60].mxu1 }
 0x488   :  { %v1723_v22 = vadd.f32 %v1699_v21, %v1613_v20  ;;  %v4469_v23 = vpop.f32.mrb[61].mxu1  ;;  %v1946_v20 = vld [vmem:[#allocation2 + $0xe0] sm:$0xff] }
 0x48a   :  { %5203 = vtanh.f32 %v1723_v22 }
 0x48b   :  { %v1704_v25 = vpop.f32.mrb[62].mxu1 }
 0x48c   :  { %v1724_v26 = vadd.f32 %v1704_v25, %v1614_v24  ;;  %v4472_v27 = vpop.f32.mrb[63].mxu1  ;;  %v1947_v25 = vld [vmem:[#allocation2 + $0xe8] sm:$0xff] }
 0x48e   :  { %5205 = vtanh.f32 %v1724_v26 }
 0x48f   :  { %v1709_v29 = vpop.f32.mrb[64].mxu1 }
 0x490   :  { %v1725_v30 = vadd.f32 %v1709_v29, %v1615_v28  ;;  %v4475_v31 = vpop.f32.mrb[65].mxu1 }
 0x492   :  { %5207 = vtanh.f32 %v1725_v30 }
 0x493   :  { %v1714_v33 = vpop.f32.mrb[66].mxu1 }
 0x494   :  { %v5204_v34 = vpop.eup %5203  ;;  %v1726_v35 = vadd.f32 %v1714_v33, %v1616_v32  ;;  %v4478_v37 = vpop.f32.mrb[67].mxu1 }
 0x495   :  { %4537 = vmatmul.mubr.msk.f32.vlgmr.msra.gmra.mrb[50].mxu0 %vm489_vm2, %v5204_v34 }
 0x496   :  { %5209 = vtanh.f32 %v1726_v35  ;;  %4939 = vmatpush3.bf16.msra.mxu0 %v5631_v53  ;;  %4539 = vmatprep.mubr.msk.f32.mxu0 %vm5319_vm1, %v5320_v36 }
 0x497   :  { %v1719_v39 = vpop.f32.mrb[68].mxu1  ;;  %4940 = vmatprep.subr.bf16.mxu0 %v5318_v8 }
 0x498   :  { %v5206_v40 = vpop.eup %5205  ;;  %v1727_v42 = vadd.f32 %v1719_v39, %v1617_v38  ;;  %v4481_v43 = vpop.f32.mrb[69].mxu1 }
 0x499   :  { %4540 = vmatmul.mubr.msk.f32.gmra.mrb[52].mxu0 %vm489_vm2, %v5206_v40 }
 0x49a   :  { %5211 = vtanh.f32 %v1727_v42  ;;  %4542 = vmatprep.mubr.msk.f32.mxu0 %vm5319_vm1, %v5320_v36  ;;  %4942 = vmatpush3.bf16.msra.mxu0 %v5643_v62 }
 0x49b   :  { %4943 = vmatprep.subr.bf16.mxu0 %v5318_v8 }
 0x49c   :  { %v5208_v44 = vpop.eup %5207 }
 0x49d   :  { %4543 = vmatmul.mubr.msk.f32.gmra.mrb[54].mxu0 %vm489_vm2, %v5208_v44 }
 0x49e   :  { %4545 = vmatprep.mubr.msk.f32.mxu0 %vm5319_vm1, %v5320_v36 }
 0x4a0   :  { %v5210_v45 = vpop.eup %5209 }
 0x4a1   :  { %4546 = vmatmul.mubr.msk.f32.gmra.mrb[56].mxu0 %vm489_vm2, %v5210_v45 }
 0x4a2   :  { %4548 = vmatprep.mubr.msk.f32.mxu0 %vm5319_vm1, %v5320_v36 }
 0x4a4   :  { %v5212_v46 = vpop.eup %5211 }
 0x4a5   :  { %4549 = vmatmul.mubr.msk.f32.gmra.mrb[58].mxu0 %vm489_vm2, %v5212_v46 }
 0x4a6   :  { %4559 = vmatprep.mubr.msk.f32.mxu0 %vm5319_vm1, %v5320_v36 }
 0x4a9   :  { %4560 = vmatmul.mubr.msk.f32.vlgmr.msra.gmra.mrb[60].mxu0 %vm489_vm2, %v5204_v34 }
 0x4aa   :  { %4945 = vmatpush3.bf16.msra.mxu0 %v5666_v10  ;;  %4562 = vmatprep.mubr.msk.f32.mxu0 %vm5319_vm1, %v5320_v36 }
 0x4ab   :  { %4946 = vmatprep.subr.bf16.mxu0 %v5318_v8 }
 0x4ad   :  { %4563 = vmatmul.mubr.msk.f32.gmra.mrb[62].mxu0 %vm489_vm2, %v5206_v40 }
 0x4ae   :  { %4565 = vmatprep.mubr.msk.f32.mxu0 %vm5319_vm1, %v5320_v36  ;;  %4948 = vmatpush3.bf16.msra.mxu0 %v5678_v13 }
 0x4af   :  { %v1904_v47 = vpop.f32.mrb[70].mxu1  ;;  %4967 = vmatprep.subr.bf16.mxu0 %v5318_v8 }
 0x4b0   :  { %v5022_v48 = vadd.f32 %v5797_v2, %v1904_v47  ;;  %v4515_v49 = vpop.f32.mrb[71].mxu1 }
 0x4b1   :  { %4566 = vmatmul.mubr.msk.f32.gmra.mrb[64].mxu0 %vm489_vm2, %v5208_v44 }
 0x4b2   :  { %5213 = vtanh.f32 %v5022_v48  ;;  %4568 = vmatprep.mubr.msk.f32.mxu0 %vm5319_vm1, %v5320_v36 }
 0x4b3   :  { %v1909_v50 = vpop.f32.mrb[72].mxu1 }
 0x4b4   :  { %v5023_v51 = vadd.f32 %v5797_v2, %v1909_v50  ;;  %v4518_v52 = vpop.f32.mrb[73].mxu1 }
 0x4b5   :  { %4569 = vmatmul.mubr.msk.f32.gmra.mrb[66].mxu0 %vm489_vm2, %v5210_v45 }
 0x4b6   :  { %5215 = vtanh.f32 %v5023_v51  ;;  %4571 = vmatprep.mubr.msk.f32.mxu0 %vm5319_vm1, %v5320_v36 }
 0x4b7   :  { %v1914_v54 = vpop.f32.mrb[74].mxu1 }
 0x4b8   :  { %v5024_v41 = vadd.f32 %v5797_v2, %v1914_v54  ;;  %v4521_v55 = vpop.f32.mrb[75].mxu1 }
 0x4b9   :  { %4572 = vmatmul.mubr.msk.f32.gmra.mrb[68].mxu0 %vm489_vm2, %v5212_v46 }
 0x4ba   :  { %5217 = vtanh.f32 %v5024_v41  ;;  %4582 = vmatprep.mubr.msk.f32.mxu0 %vm5319_vm1, %v5320_v36  ;;  %v2273_v41 = vld [vmem:[#allocation2 + $0xf0] sm:$0xff] }
 0x4bb   :  { %v1919_v56 = vpop.f32.mrb[76].mxu1 }
 0x4bc   :  { %v5214_v57 = vpop.eup %5213  ;;  %v5025_v58 = vadd.f32 %v5797_v2, %v1919_v56  ;;  %v4524_v59 = vpop.f32.mrb[77].mxu1 }
 0x4bd   :  { %1938 = vst.msk [vmem:[#allocation3 + $0x78] sm:$0xff] %vm489_vm2, %v5214_v57  ;;  %4583 = vmatmul.mubr.msk.f32.vlgmr.msra.gmra.mrb[60].mxu0 %vm489_vm2, %v5214_v57 }
 0x4be   :  { %5219 = vtanh.f32 %v5025_v58  ;;  %4585 = vmatprep.mubr.msk.f32.mxu0 %vm5319_vm1, %v5320_v36  ;;  %4969 = vmatpush3.bf16.msra.mxu0 %v5398_v7  ;;  %v2274_v58 = vld [vmem:[#allocation2 + $0xf8] sm:$0xff] }
 0x4bf   :  { %v1924_v60 = vpop.f32.mrb[78].mxu1  ;;  %4970 = vmatprep.subr.bf16.mxu0 %v5318_v8 }
 0x4c0   :  { %v5216_v61 = vpop.eup %5215  ;;  %v5026_v63 = vadd.f32 %v5797_v2, %v1924_v60  ;;  %v4527_v0 = vpop.f32.mrb[79].mxu1 }
 0x4c1   :  { %1939 = vst.msk [vmem:[#allocation3 + $0x80] sm:$0xff] %vm489_vm2, %v5216_v61  ;;  %4586 = vmatmul.mubr.msk.f32.gmra.mrb[62].mxu0 %vm489_vm2, %v5216_v61 }
 0x4c2   :  { %5221 = vtanh.f32 %v5026_v63  ;;  %4588 = vmatprep.mubr.msk.f32.mxu0 %vm5319_vm1, %v5320_v36  ;;  %4972 = vmatpush3.bf16.msra.mxu0 %v5423_v15  ;;  %v1943_v15 = vld [vmem:[#allocation2 + $0xc8] sm:$0xff]  ;;  %v2275_v63 = vld [vmem:[#allocation2 + $0x100] sm:$0xff] }
 0x4c3   :  { %4973 = vmatprep.subr.bf16.mxu0 %v5318_v8 }
 0x4c4   :  { %v5218_v7 = vpop.eup %5217 }
 0x4c5   :  { %1940 = vst.msk [vmem:[#allocation3 + $0x88] sm:$0xff] %vm489_vm2, %v5218_v7  ;;  %4589 = vmatmul.mubr.msk.f32.gmra.mrb[64].mxu0 %vm489_vm2, %v5218_v7 }
 0x4c6   :  { %4591 = vmatprep.mubr.msk.f32.mxu0 %vm5319_vm1, %v5320_v36 }
 0x4c8   :  { %v5220_v1 = vpop.eup %5219 }
 0x4c9   :  { %1941 = vst.msk [vmem:[#allocation3 + $0x90] sm:$0xff] %vm489_vm2, %v5220_v1  ;;  %4592 = vmatmul.mubr.msk.f32.gmra.mrb[66].mxu0 %vm489_vm2, %v5220_v1 }
 0x4ca   :  { %4594 = vmatprep.mubr.msk.f32.mxu0 %vm5319_vm1, %v5320_v36 }
 0x4cc   :  { %v5222_v3 = vpop.eup %5221 }
 0x4cd   :  { %1942 = vst.msk [vmem:[#allocation3 + $0x98] sm:$0xff] %vm489_vm2, %v5222_v3  ;;  %4595 = vmatmul.mubr.msk.f32.gmra.mrb[68].mxu0 %vm489_vm2, %v5222_v3  ;;  %v2276_v3 = vld [vmem:[#allocation2 + $0x108] sm:$0xff] }
 0x4ce   :  { %4674 = vmatprep.mubr.msk.f32.mxu0 %vm5319_vm1, %v5320_v36 }
 0x568   :  { %v2029_v4 = vpop.f32.mrb[50].mxu0 }
 0x569   :  { %v2053_v5 = vadd.f32 %v2029_v4, %v1943_v15  ;;  %v4538_v6 = vpop.f32.mrb[51].mxu0 }
 0x56b   :  { %5223 = vtanh.f32 %v2053_v5 }
 0x56c   :  { %v2034_v11 = vpop.f32.mrb[52].mxu0 }
 0x56d   :  { %v2054_v12 = vadd.f32 %v2034_v11, %v1944_v9  ;;  %v4541_v14 = vpop.f32.mrb[53].mxu0  ;;  %v2277_v9 = vld [vmem:[#allocation2 + $0x110] sm:$0xff] }
 0x56f   :  { %5225 = vtanh.f32 %v2054_v12 }
 0x570   :  { %v2039_v17 = vpop.f32.mrb[54].mxu0 }
 0x571   :  { %v2055_v18 = vadd.f32 %v2039_v17, %v1945_v16  ;;  %v4544_v19 = vpop.f32.mrb[55].mxu0 }
 0x572   :  { %v3210_v19 = vld [vmem:[%s6380_s7 + $0x8] sm:$0xff] }
 0x573   :  { %5227 = vtanh.f32 %v2055_v18 }
 0x574   :  { %v2044_v21 = vpop.f32.mrb[56].mxu0 }
 0x575   :  { %v5224_v22 = vpop.eup %5223  ;;  %v2056_v23 = vadd.f32 %v2044_v21, %v1946_v20  ;;  %v4547_v24 = vpop.f32.mrb[57].mxu0 }
 0x576   :  { %4606 = vmatmul.mubr.msk.f32.vlgmr.msra.gmra.mrb[80].mxu1 %vm489_vm2, %v5224_v22 }
 0x577   :  { %5229 = vtanh.f32 %v2056_v23  ;;  %4957 = vmatpush3.bf16.msra.mxu1 %v5631_v53  ;;  %4608 = vmatprep.mubr.msk.f32.mxu1 %vm5319_vm1, %v5320_v36 }
 0x578   :  { %v2049_v26 = vpop.f32.mrb[58].mxu0  ;;  %4958 = vmatprep.subr.bf16.mxu1 %v5318_v8 }
 0x579   :  { %v5226_v27 = vpop.eup %5225  ;;  %v2057_v28 = vadd.f32 %v2049_v26, %v1947_v25  ;;  %v4550_v29 = vpop.f32.mrb[59].mxu0 }
 0x57a   :  { %4609 = vmatmul.mubr.msk.f32.gmra.mrb[82].mxu1 %vm489_vm2, %v5226_v27 }
 0x57b   :  { %5231 = vtanh.f32 %v2057_v28  ;;  %4611 = vmatprep.mubr.msk.f32.mxu1 %vm5319_vm1, %v5320_v36  ;;  %4960 = vmatpush3.bf16.msra.mxu1 %v5643_v62 }
 0x57c   :  { %4961 = vmatprep.subr.bf16.mxu1 %v5318_v8 }
 0x57d   :  { %v5228_v30 = vpop.eup %5227 }
 0x57e   :  { %4612 = vmatmul.mubr.msk.f32.gmra.mrb[84].mxu1 %vm489_vm2, %v5228_v30 }
 0x57f   :  { %4614 = vmatprep.mubr.msk.f32.mxu1 %vm5319_vm1, %v5320_v36 }
 0x581   :  { %v5230_v31 = vpop.eup %5229 }
 0x582   :  { %4615 = vmatmul.mubr.msk.f32.gmra.mrb[86].mxu1 %vm489_vm2, %v5230_v31 }
 0x583   :  { %4617 = vmatprep.mubr.msk.f32.mxu1 %vm5319_vm1, %v5320_v36 }
 0x585   :  { %v5232_v32 = vpop.eup %5231 }
 0x586   :  { %4618 = vmatmul.mubr.msk.f32.gmra.mrb[88].mxu1 %vm489_vm2, %v5232_v32 }
 0x587   :  { %4628 = vmatprep.mubr.msk.f32.mxu1 %vm5319_vm1, %v5320_v36 }
 0x58a   :  { %4629 = vmatmul.mubr.msk.f32.vlgmr.msra.gmra.mrb[90].mxu1 %vm489_vm2, %v5224_v22  ;;  %v6145_v22 = vld [vmem:[%s6379_s6] ss:$0 sm:$0xff] }
 0x58b   :  { %4963 = vmatpush3.bf16.msra.mxu1 %v5666_v10  ;;  %4631 = vmatprep.mubr.msk.f32.mxu1 %vm5319_vm1, %v5320_v36 }
 0x58c   :  { %4964 = vmatprep.subr.bf16.mxu1 %v5318_v8 }
 0x58e   :  { %4632 = vmatmul.mubr.msk.f32.gmra.mrb[92].mxu1 %vm489_vm2, %v5226_v27 }
 0x58f   :  { %4634 = vmatprep.mubr.msk.f32.mxu1 %vm5319_vm1, %v5320_v36  ;;  %4966 = vmatpush3.bf16.msra.mxu1 %v5678_v13 }
 0x590   :  { %v2234_v33 = vpop.f32.mrb[60].mxu0  ;;  %4985 = vmatprep.subr.bf16.mxu1 %v5318_v8 }
 0x591   :  { %v5027_v34 = vadd.f32 %v5797_v2, %v2234_v33  ;;  %v4584_v35 = vpop.f32.mrb[61].mxu0 }
 0x592   :  { %4635 = vmatmul.mubr.msk.f32.gmra.mrb[94].mxu1 %vm489_vm2, %v5228_v30 }
 0x593   :  { %5233 = vtanh.f32 %v5027_v34  ;;  %4637 = vmatprep.mubr.msk.f32.mxu1 %vm5319_vm1, %v5320_v36 }
 0x594   :  { %v2239_v37 = vpop.f32.mrb[62].mxu0 }
 0x595   :  { %v5028_v38 = vadd.f32 %v5797_v2, %v2239_v37  ;;  %v4587_v39 = vpop.f32.mrb[63].mxu0 }
 0x596   :  { %4638 = vmatmul.mubr.msk.f32.gmra.mrb[96].mxu1 %vm489_vm2, %v5230_v31  ;;  %v3211_v31 = vld [vmem:[%s6380_s7 + $0x10] sm:$0xff] }
 0x597   :  { %5235 = vtanh.f32 %v5028_v38  ;;  %4640 = vmatprep.mubr.msk.f32.mxu1 %vm5319_vm1, %v5320_v36 }
 0x598   :  { %v2244_v40 = vpop.f32.mrb[64].mxu0 }
 0x599   :  { %v5029_v42 = vadd.f32 %v5797_v2, %v2244_v40  ;;  %v4590_v43 = vpop.f32.mrb[65].mxu0 }
 0x59a   :  { %4641 = vmatmul.mubr.msk.f32.gmra.mrb[98].mxu1 %vm489_vm2, %v5232_v32  ;;  %v3212_v32 = vld [vmem:[%s6380_s7 + $0x18] sm:$0xff] }
 0x59b   :  { %5237 = vtanh.f32 %v5029_v42  ;;  %4651 = vmatprep.mubr.msk.f32.mxu1 %vm5319_vm1, %v5320_v36  ;;  %v5001_v34 = vpack.c.bf16 %v3212_v32, %v3211_v31 }
 0x59c   :  { %v2249_v44 = vpop.f32.mrb[66].mxu0 }
 0x59d   :  { %v5234_v45 = vpop.eup %5233  ;;  %v5030_v46 = vadd.f32 %v5797_v2, %v2249_v44  ;;  %v4593_v47 = vpop.f32.mrb[67].mxu0 }
 0x59e   :  { %2268 = vst.msk [vmem:[#allocation3 + $0xa0] sm:$0xff] %vm489_vm2, %v5234_v45  ;;  %4652 = vmatmul.mubr.msk.f32.vlgmr.msra.gmra.mrb[90].mxu1 %vm489_vm2, %v5234_v45  ;;  %v3169_v47 = vld [vmem:[#allocation3] sm:$0xff] }
 0x59f   :  { %5239 = vtanh.f32 %v5030_v46  ;;  %4654 = vmatprep.mubr.msk.f32.mxu1 %vm5319_vm1, %v5320_v36  ;;  %4987 = vmatpush3.bf16.msra.mxu1 %v5631_v53 }
 0x5a0   :  { %v2254_v48 = vpop.f32.mrb[68].mxu0  ;;  %4988 = vmatprep.subr.bf16.mxu1 %v5318_v8 }
 0x5a1   :  { %v5236_v49 = vpop.eup %5235  ;;  %v5031_v50 = vadd.f32 %v5797_v2, %v2254_v48  ;;  %v4596_v51 = vpop.f32.mrb[69].mxu0  ;;  %v3170_v48 = vld [vmem:[#allocation3 + $0x8] sm:$0xff] }
 0x5a2   :  { %2269 = vst.msk [vmem:[#allocation3 + $0xa8] sm:$0xff] %vm489_vm2, %v5236_v49  ;;  %4655 = vmatmul.mubr.msk.f32.gmra.mrb[92].mxu1 %vm489_vm2, %v5236_v49  ;;  %v3171_v49 = vld [vmem:[#allocation3 + $0x10] sm:$0xff]  ;;  %v3173_v51 = vld [vmem:[#allocation3 + $0x20] sm:$0xff] }
 0x5a3   :  { %5241 = vtanh.f32 %v5031_v50  ;;  %4657 = vmatprep.mubr.msk.f32.mxu1 %vm5319_vm1, %v5320_v36  ;;  %4990 = vmatpush3.bf16.msra.mxu1 %v5643_v62  ;;  %v3172_v50 = vld [vmem:[#allocation3 + $0x18] sm:$0xff] }
 0x5a4   :  { %4991 = vmatprep.subr.bf16.mxu1 %v5318_v8 }
 0x5a5   :  { %v5238_v52 = vpop.eup %5237 }
 0x5a6   :  { %2270 = vst.msk [vmem:[#allocation3 + $0xb0] sm:$0xff] %vm489_vm2, %v5238_v52  ;;  %4658 = vmatmul.mubr.msk.f32.gmra.mrb[94].mxu1 %vm489_vm2, %v5238_v52  ;;  %v3174_v52 = vld [vmem:[#allocation3 + $0x28] sm:$0xff] }
 0x5a7   :  { %4660 = vmatprep.mubr.msk.f32.mxu1 %vm5319_vm1, %v5320_v36 }
 0x5a9   :  { %v5240_v2 = vpop.eup %5239 }
 0x5aa   :  { %2271 = vst.msk [vmem:[#allocation3 + $0xb8] sm:$0xff] %vm489_vm2, %v5240_v2  ;;  %4661 = vmatmul.mubr.msk.f32.gmra.mrb[96].mxu1 %vm489_vm2, %v5240_v2  ;;  %v3175_v2 = vld [vmem:[#allocation3 + $0x30] sm:$0xff] }
 0x5ab   :  { %4663 = vmatprep.mubr.msk.f32.mxu1 %vm5319_vm1, %v5320_v36 }
 0x5ad   :  { %v5242_v54 = vpop.eup %5241 }
 0x5ae   :  { %2272 = vst.msk [vmem:[#allocation3 + $0xc0] sm:$0xff] %vm489_vm2, %v5242_v54  ;;  %4664 = vmatmul.mubr.msk.f32.gmra.mrb[98].mxu1 %vm489_vm2, %v5242_v54  ;;  %v3176_v54 = vld [vmem:[#allocation3 + $0x38] sm:$0xff] }
 0x5af   :  { %4743 = vmatprep.mubr.msk.f32.mxu1 %vm5319_vm1, %v5320_v36 }
 0x649   :  { %v2359_v55 = vpop.f32.mrb[80].mxu1 }
 0x64a   :  { %v2383_v56 = vadd.f32 %v2359_v55, %v2273_v41  ;;  %v4607_v57 = vpop.f32.mrb[81].mxu1  ;;  %v3177_v41 = vld [vmem:[#allocation3 + $0x40] sm:$0xff]  ;;  %v3178_v55 = vld [vmem:[#allocation3 + $0x48] sm:$0xff] }
 0x64b   :  { %v3180_v57 = vld [vmem:[#allocation3 + $0x58] sm:$0xff] }
 0x64c   :  { %5243 = vtanh.f32 %v2383_v56  ;;  %v3179_v56 = vld [vmem:[#allocation3 + $0x50] sm:$0xff] }
 0x64d   :  { %v2364_v59 = vpop.f32.mrb[82].mxu1 }
 0x64e   :  { %v2384_v60 = vadd.f32 %v2364_v59, %v2274_v58  ;;  %v4610_v61 = vpop.f32.mrb[83].mxu1  ;;  %v3181_v58 = vld [vmem:[#allocation3 + $0x60] sm:$0xff]  ;;  %v3182_v59 = vld [vmem:[#allocation3 + $0x68] sm:$0xff] }
 0x64f   :  { %v3184_v61 = vld [vmem:[#allocation3 + $0x78] sm:$0xff] }
 0x650   :  { %5245 = vtanh.f32 %v2384_v60  ;;  %v3183_v60 = vld [vmem:[#allocation3 + $0x70] sm:$0xff] }
 0x651   :  { %v2369_v0 = vpop.f32.mrb[84].mxu1 }
 0x652   :  { %v2385_v7 = vadd.f32 %v2369_v0, %v2275_v63  ;;  %v4613_v1 = vpop.f32.mrb[85].mxu1  ;;  %v3185_v63 = vld [vmem:[#allocation3 + $0x80] sm:$0xff]  ;;  %v3186_v0 = vld [vmem:[#allocation3 + $0x88] sm:$0xff] }
 0x653   :  { %v3188_v1 = vld [vmem:[#allocation3 + $0x98] sm:$0xff] }
 0x654   :  { %5247 = vtanh.f32 %v2385_v7  ;;  %v3187_v7 = vld [vmem:[#allocation3 + $0x90] sm:$0xff] }
 0x655   :  { %v2374_v15 = vpop.f32.mrb[86].mxu1 }
 0x656   :  { %v5244_v4 = vpop.eup %5243  ;;  %v2386_v5 = vadd.f32 %v2374_v15, %v2276_v3  ;;  %v4616_v6 = vpop.f32.mrb[87].mxu1  ;;  %v3189_v3 = vld [vmem:[#allocation3 + $0xa0] sm:$0xff]  ;;  %v3190_v15 = vld [vmem:[#allocation3 + $0xa8] sm:$0xff] }
 0x657   :  { %4675 = vmatmul.mubr.msk.f32.vlgmr.msra.gmra.mrb[70].mxu0 %vm489_vm2, %v5244_v4  ;;  %v3193_v6 = vld [vmem:[#allocation3 + $0xc0] sm:$0xff] }
 0x658   :  { %5249 = vtanh.f32 %v2386_v5  ;;  %4975 = vmatpush3.bf16.msra.mxu0 %v5631_v53  ;;  %4677 = vmatprep.mubr.msk.f32.mxu0 %vm5319_vm1, %v5320_v36  ;;  %v3192_v5 = vld [vmem:[#allocation3 + $0xb8] sm:$0xff] }
 0x659   :  { %v2379_v11 = vpop.f32.mrb[88].mxu1  ;;  %4976 = vmatprep.subr.bf16.mxu0 %v5318_v8 }
 0x65a   :  { %v5246_v12 = vpop.eup %5245  ;;  %v2387_v14 = vadd.f32 %v2379_v11, %v2277_v9  ;;  %v4619_v16 = vpop.f32.mrb[89].mxu1 }
 0x65b   :  { %4678 = vmatmul.mubr.msk.f32.gmra.mrb[72].mxu0 %vm489_vm2, %v5246_v12 }
 0x65c   :  { %5251 = vtanh.f32 %v2387_v14  ;;  %4680 = vmatprep.mubr.msk.f32.mxu0 %vm5319_vm1, %v5320_v36  ;;  %4978 = vmatpush3.bf16.msra.mxu0 %v5643_v62  ;;  %v3209_v62 = vld [vmem:[%s6380_s7] sm:$0xff] }
 0x65d   :  { %4979 = vmatprep.subr.bf16.mxu0 %v5318_v8  ;;  %v4997_v20 = vpack.c.bf16 %v3210_v19, %v3209_v62  ;;  %v2604_v19 = vld [vmem:[#allocation2 + $0x120] sm:$0xff] }
 0x65e   :  { %v5248_v53 = vpop.eup %5247 }
 0x65f   :  { %4681 = vmatmul.mubr.msk.f32.gmra.mrb[74].mxu0 %vm489_vm2, %v5248_v53 }
 0x660   :  { %4683 = vmatprep.mubr.msk.f32.mxu0 %vm5319_vm1, %v5320_v36 }
 0x662   :  { %v5250_v17 = vpop.eup %5249 }
 0x663   :  { %4684 = vmatmul.mubr.msk.f32.gmra.mrb[76].mxu0 %vm489_vm2, %v5250_v17 }
 0x664   :  { %4686 = vmatprep.mubr.msk.f32.mxu0 %vm5319_vm1, %v5320_v36 }
 0x666   :  { %v5252_v18 = vpop.eup %5251 }
 0x667   :  { %4687 = vmatmul.mubr.msk.f32.gmra.mrb[78].mxu0 %vm489_vm2, %v5252_v18 }
 0x668   :  { %4697 = vmatprep.mubr.msk.f32.mxu0 %vm5319_vm1, %v5320_v36 }
 0x66b   :  { %4698 = vmatmul.mubr.msk.f32.vlgmr.msra.gmra.mrb[80].mxu0 %vm489_vm2, %v5244_v4  ;;  %v3191_v4 = vld [vmem:[#allocation3 + $0xb0] sm:$0xff] }
 0x66c   :  { %4981 = vmatpush3.bf16.msra.mxu0 %v5666_v10  ;;  %4700 = vmatprep.mubr.msk.f32.mxu0 %vm5319_vm1, %v5320_v36 }
 0x66d   :  { %4982 = vmatprep.subr.bf16.mxu0 %v5318_v8 }
 0x66f   :  { %4701 = vmatmul.mubr.msk.f32.gmra.mrb[82].mxu0 %vm489_vm2, %v5246_v12 }
 0x670   :  { %4703 = vmatprep.mubr.msk.f32.mxu0 %vm5319_vm1, %v5320_v36  ;;  %4984 = vmatpush3.bf16.msra.mxu0 %v5678_v13 }
 0x671   :  { %v2564_v21 = vpop.f32.mrb[90].mxu1  ;;  %4998 = vmatprep.subr.bf16.mxu0 %v4997_v20 }
 0x672   :  { %v5032_v23 = vadd.f32 %v6145_v22, %v2564_v21  ;;  %v4653_v24 = vpop.f32.mrb[91].mxu1 }
 0x673   :  { %4704 = vmatmul.mubr.msk.f32.gmra.mrb[84].mxu0 %vm489_vm2, %v5248_v53  ;;  %v2603_v53 = vld [vmem:[#allocation2 + $0x118] sm:$0xff]  ;;  %v2605_v24 = vld [vmem:[#allocation2 + $0x128] sm:$0xff] }
 0x674   :  { %5253 = vtanh.f32 %v5032_v23  ;;  %4706 = vmatprep.mubr.msk.f32.mxu0 %vm5319_vm1, %v5320_v36 }
 0x675   :  { %v2569_v25 = vpop.f32.mrb[92].mxu1 }
 0x676   :  { %v5033_v26 = vadd.f32 %v6145_v22, %v2569_v25  ;;  %v4656_v27 = vpop.f32.mrb[93].mxu1 }
 0x677   :  { %4707 = vmatmul.mubr.msk.f32.gmra.mrb[86].mxu0 %vm489_vm2, %v5250_v17 }
 0x678   :  { %5255 = vtanh.f32 %v5033_v26  ;;  %4709 = vmatprep.mubr.msk.f32.mxu0 %vm5319_vm1, %v5320_v36 }
 0x679   :  { %v2574_v28 = vpop.f32.mrb[94].mxu1 }
 0x67a   :  { %v5034_v29 = vadd.f32 %v6145_v22, %v2574_v28  ;;  %v4659_v30 = vpop.f32.mrb[95].mxu1  ;;  %v2606_v28 = vld [vmem:[#allocation2 + $0x130] sm:$0xff] }
 0x67b   :  { %4710 = vmatmul.mubr.msk.f32.gmra.mrb[88].mxu0 %vm489_vm2, %v5252_v18 }
 0x67c   :  { %5257 = vtanh.f32 %v5034_v29  ;;  %4720 = vmatprep.mubr.msk.f32.mxu0 %vm5319_vm1, %v5320_v36 }
 0x67d   :  { %v2579_v33 = vpop.f32.mrb[96].mxu1 }
 0x67e   :  { %v5254_v35 = vpop.eup %5253  ;;  %v5035_v37 = vadd.f32 %v6145_v22, %v2579_v33  ;;  %v4662_v38 = vpop.f32.mrb[97].mxu1  ;;  %v2607_v33 = vld [vmem:[#allocation2 + $0x138] sm:$0xff] }
 0x67f   :  { %2598 = vst.msk [vmem:[#allocation3 + $0xc8] sm:$0xff] %vm489_vm2, %v5254_v35  ;;  %4721 = vmatmul.mubr.msk.f32.vlgmr.msra.gmra.mrb[80].mxu0 %vm489_vm2, %v5254_v35 }
 0x680   :  { %5259 = vtanh.f32 %v5035_v37  ;;  %4723 = vmatprep.mubr.msk.f32.mxu0 %vm5319_vm1, %v5320_v36  ;;  %5000 = vmatpush3.bf16.msra.mxu0 %v4997_v20 }
 0x681   :  { %v2584_v39 = vpop.f32.mrb[98].mxu1  ;;  %5002 = vmatprep.subr.bf16.mxu0 %v5001_v34 }
 0x682   :  { %v5256_v40 = vpop.eup %5255  ;;  %v5036_v42 = vadd.f32 %v6145_v22, %v2584_v39  ;;  %v4665_v43 = vpop.f32.mrb[99].mxu1 }
 0x683   :  { %2599 = vst.msk [vmem:[#allocation3 + $0xd0] sm:$0xff] %vm489_vm2, %v5256_v40  ;;  %4724 = vmatmul.mubr.msk.f32.gmra.mrb[82].mxu0 %vm489_vm2, %v5256_v40 }
 0x684   :  { %5261 = vtanh.f32 %v5036_v42  ;;  %4726 = vmatprep.mubr.msk.f32.mxu0 %vm5319_vm1, %v5320_v36  ;;  %5004 = vmatpush3.bf16.msra.mxu0 %v5001_v34 }
 0x686   :  { %v5258_v44 = vpop.eup %5257  ;;  %v3194_v9 = vld [vmem:[#allocation3 + $0xc8] sm:$0xff] }
 0x687   :  { %2600 = vst.msk [vmem:[#allocation3 + $0xd8] sm:$0xff] %vm489_vm2, %v5258_v44  ;;  %4727 = vmatmul.mubr.msk.f32.gmra.mrb[84].mxu0 %vm489_vm2, %v5258_v44 }
 0x688   :  { %4729 = vmatprep.mubr.msk.f32.mxu0 %vm5319_vm1, %v5320_v36 }
 0x68a   :  { %v5260_v45 = vpop.eup %5259  ;;  %v3195_v11 = vld [vmem:[#allocation3 + $0xd0] sm:$0xff] }
 0x68b   :  { %2601 = vst.msk [vmem:[#allocation3 + $0xe0] sm:$0xff] %vm489_vm2, %v5260_v45  ;;  %4730 = vmatmul.mubr.msk.f32.gmra.mrb[86].mxu0 %vm489_vm2, %v5260_v45 }
 0x68c   :  { %4732 = vmatprep.mubr.msk.f32.mxu0 %vm5319_vm1, %v5320_v36 }
 0x68e   :  { %v5262_v46 = vpop.eup %5261  ;;  %v3196_v12 = vld [vmem:[#allocation3 + $0xd8] sm:$0xff] }
 0x68f   :  { %2602 = vst.msk [vmem:[#allocation3 + $0xe8] sm:$0xff] %vm489_vm2, %v5262_v46  ;;  %4733 = vmatmul.mubr.msk.f32.gmra.mrb[88].mxu0 %vm489_vm2, %v5262_v46 }
 0x690   :  { %4789 = vmatprep.mubr.msk.f32.mxu0 %vm489_vm2, %v3169_v47 }
 0x692   :  { %v3197_v14 = vld [vmem:[#allocation3 + $0xe0] sm:$0xff] }
 0x693   :  { %4790 = vmatmul.mubr.msk.f32.vlgmr.msra.gmra.mrb[90].mxu0 %vm489_vm2, %v3170_v48 }
 0x694   :  { %4792 = vmatprep.mubr.msk.f32.mxu0 %vm489_vm2, %v3171_v49 }
 0x696   :  { %v3198_v16 = vld [vmem:[#allocation3 + $0xe8] sm:$0xff] }
 0x697   :  { %4793 = vmatmul.mubr.msk.f32.gmra.mrb[92].mxu0 %vm489_vm2, %v3172_v50 }
 0x698   :  { %4795 = vmatprep.mubr.msk.f32.mxu0 %vm489_vm2, %v3173_v51 }
 0x69b   :  { %4796 = vmatmul.mubr.msk.f32.gmra.mrb[94].mxu0 %vm489_vm2, %v3174_v52 }
 0x69c   :  { %4798 = vmatprep.mubr.msk.f32.mxu0 %vm489_vm2, %v3175_v2 }
 0x69f   :  { %4799 = vmatmul.mubr.msk.f32.gmra.mrb[96].mxu0 %vm489_vm2, %v3176_v54 }
 0x6a0   :  { %4801 = vmatprep.mubr.msk.f32.mxu0 %vm489_vm2, %v3177_v41 }
 0x6a3   :  { %4802 = vmatmul.mubr.msk.f32.gmra.mrb[98].mxu0 %vm489_vm2, %v3178_v55 }
 0x6a4   :  { %4804 = vmatprep.mubr.msk.f32.mxu0 %vm489_vm2, %v3179_v56  ;;  %v6267_v56 = vld [vmem:[%s6381_s8] ss:$0 sm:$0xff] }
 0x6a7   :  { %4805 = vmatmul.mubr.msk.f32.gmra.mrb[100].mxu0 %vm489_vm2, %v3180_v57 }
 0x6a8   :  { %4807 = vmatprep.mubr.msk.f32.mxu0 %vm489_vm2, %v3181_v58 }
 0x6ab   :  { %4808 = vmatmul.mubr.msk.f32.gmra.mrb[102].mxu0 %vm489_vm2, %v3182_v59 }
 0x6ac   :  { %4810 = vmatprep.mubr.msk.f32.mxu0 %vm489_vm2, %v3183_v60 }
 0x6af   :  { %4811 = vmatmul.mubr.msk.f32.gmra.mrb[104].mxu0 %vm489_vm2, %v3184_v61 }
 0x6b0   :  { %4813 = vmatprep.mubr.msk.f32.mxu0 %vm489_vm2, %v3185_v63 }
 0x6b3   :  { %4814 = vmatmul.mubr.msk.f32.gmra.mrb[106].mxu0 %vm489_vm2, %v3186_v0 }
 0x6b4   :  { %4816 = vmatprep.mubr.msk.f32.mxu0 %vm489_vm2, %v3187_v7 }
 0x6b7   :  { %4817 = vmatmul.mubr.msk.f32.gmra.mrb[108].mxu0 %vm489_vm2, %v3188_v1 }
 0x6b8   :  { %4819 = vmatprep.mubr.msk.f32.mxu0 %vm489_vm2, %v3189_v3 }
 0x6bb   :  { %4820 = vmatmul.mubr.msk.f32.gmra.mrb[110].mxu0 %vm489_vm2, %v3190_v15 }
 0x6bc   :  { %4822 = vmatprep.mubr.msk.f32.mxu0 %vm489_vm2, %v3191_v4 }
 0x6bf   :  { %4823 = vmatmul.mubr.msk.f32.gmra.mrb[112].mxu0 %vm489_vm2, %v3192_v5 }
 0x6c0   :  { %4825 = vmatprep.mubr.msk.f32.mxu0 %vm489_vm2, %v3193_v6 }
 0x6c3   :  { %4826 = vmatmul.mubr.msk.f32.gmra.mrb[114].mxu0 %vm489_vm2, %v3194_v9 }
 0x6c4   :  { %4828 = vmatprep.mubr.msk.f32.mxu0 %vm489_vm2, %v3195_v11 }
 0x6c7   :  { %4829 = vmatmul.mubr.msk.f32.gmra.mrb[116].mxu0 %vm489_vm2, %v3196_v12 }
 0x6c8   :  { %4831 = vmatprep.mubr.msk.f32.mxu0 %vm489_vm2, %v3197_v14 }
 0x6cb   :  { %4832 = vmatmul.mubr.msk.f32.gmra.mrb[118].mxu0 %vm489_vm2, %v3198_v16 }
 0x72a   :  { %v2689_v17 = vpop.f32.mrb[70].mxu0 }
 0x72b   :  { %v2713_v18 = vadd.f32 %v2689_v17, %v2603_v53  ;;  %v4676_v62 = vpop.f32.mrb[71].mxu0 }
 0x72d   :  { %5263 = vtanh.f32 %v2713_v18 }
 0x72e   :  { %v2694_v20 = vpop.f32.mrb[72].mxu0 }
 0x72f   :  { %v2714_v21 = vadd.f32 %v2694_v20, %v2604_v19  ;;  %v4679_v23 = vpop.f32.mrb[73].mxu0 }
 0x731   :  { %5265 = vtanh.f32 %v2714_v21 }
 0x732   :  { %v2699_v25 = vpop.f32.mrb[74].mxu0 }
 0x733   :  { %v2715_v26 = vadd.f32 %v2699_v25, %v2605_v24  ;;  %v4682_v27 = vpop.f32.mrb[75].mxu0 }
 0x735   :  { %5267 = vtanh.f32 %v2715_v26 }
 0x736   :  { %v2704_v29 = vpop.f32.mrb[76].mxu0 }
 0x737   :  { %v5264_v30 = vpop.eup %5263  ;;  %v2716_v31 = vadd.f32 %v2704_v29, %v2606_v28  ;;  %v4685_v32 = vpop.f32.mrb[77].mxu0 }
 0x738   :  { %3158 = vst.msk [vmem:[%s6383_s10] sm:$0xff] %vm489_vm2, %v5264_v30  ;;  %4744 = vmatmul.mubr.msk.f32.vlgmr.msra.gmra.mrb[100].mxu1 %vm489_vm2, %v5264_v30 }
 0x739   :  { %5269 = vtanh.f32 %v2716_v31  ;;  %4746 = vmatprep.mubr.msk.f32.mxu1 %vm5319_vm1, %v5320_v36  ;;  %4993 = vmatpush3.bf16.msra.mxu1 %v5666_v10 }
 0x73a   :  { %v2709_v34 = vpop.f32.mrb[78].mxu0  ;;  %4994 = vmatprep.subr.bf16.mxu1 %v5318_v8 }
 0x73b   :  { %v5266_v35 = vpop.eup %5265  ;;  %v2717_v37 = vadd.f32 %v2709_v34, %v2607_v33  ;;  %v4688_v38 = vpop.f32.mrb[79].mxu0 }
 0x73c   :  { %3159 = vst.msk [vmem:[%s6383_s10 + $0x8] sm:$0xff] %vm489_vm2, %v5266_v35  ;;  %4747 = vmatmul.mubr.msk.f32.gmra.mrb[102].mxu1 %vm489_vm2, %v5266_v35 }
 0x73d   :  { %5271 = vtanh.f32 %v2717_v37  ;;  %4749 = vmatprep.mubr.msk.f32.mxu1 %vm5319_vm1, %v5320_v36  ;;  %4996 = vmatpush3.bf16.msra.mxu1 %v5678_v13 }
 0x73f   :  { %v5268_v10 = vpop.eup %5267 }
 0x740   :  { %3160 = vst.msk [vmem:[%s6383_s10 + $0x10] sm:$0xff] %vm489_vm2, %v5268_v10  ;;  %4750 = vmatmul.mubr.msk.f32.gmra.mrb[104].mxu1 %vm489_vm2, %v5268_v10 }
 0x741   :  { %4752 = vmatprep.mubr.msk.f32.mxu1 %vm5319_vm1, %v5320_v36 }
 0x743   :  { %v5270_v8 = vpop.eup %5269 }
 0x744   :  { %3161 = vst.msk [vmem:[%s6383_s10 + $0x18] sm:$0xff] %vm489_vm2, %v5270_v8  ;;  %4753 = vmatmul.mubr.msk.f32.gmra.mrb[106].mxu1 %vm489_vm2, %v5270_v8 }
 0x745   :  { %4755 = vmatprep.mubr.msk.f32.mxu1 %vm5319_vm1, %v5320_v36 }
 0x747   :  { %v5272_v13 = vpop.eup %5271 }
 0x748   :  { %3162 = vst.msk [vmem:[%s6383_s10 + $0x20] sm:$0xff] %vm489_vm2, %v5272_v13  ;;  %4756 = vmatmul.mubr.msk.f32.gmra.mrb[108].mxu1 %vm489_vm2, %v5272_v13 }
 0x749   :  { %4766 = vmatprep.mubr.msk.f32.mxu1 %vm5319_vm1, %v5320_v36 }
 0x752   :  { %v2894_v39 = vpop.f32.mrb[80].mxu0 }
 0x753   :  { %v5037_v40 = vadd.f32 %v6145_v22, %v2894_v39  ;;  %v4722_v42 = vpop.f32.mrb[81].mxu0 }
 0x755   :  { %5273 = vtanh.f32 %v5037_v40 }
 0x756   :  { %v2899_v43 = vpop.f32.mrb[82].mxu0 }
 0x757   :  { %v5038_v44 = vadd.f32 %v6145_v22, %v2899_v43  ;;  %v4725_v45 = vpop.f32.mrb[83].mxu0 }
 0x759   :  { %5275 = vtanh.f32 %v5038_v44 }
 0x75a   :  { %v2904_v46 = vpop.f32.mrb[84].mxu0 }
 0x75b   :  { %v5039_v47 = vadd.f32 %v6145_v22, %v2904_v46  ;;  %v4728_v48 = vpop.f32.mrb[85].mxu0 }
 0x75d   :  { %5277 = vtanh.f32 %v5039_v47 }
 0x75e   :  { %v2909_v49 = vpop.f32.mrb[86].mxu0 }
 0x75f   :  { %v5274_v50 = vpop.eup %5273  ;;  %v5040_v51 = vadd.f32 %v6145_v22, %v2909_v49  ;;  %v4731_v52 = vpop.f32.mrb[87].mxu0 }
 0x760   :  { %2928 = vst.msk [vmem:[#allocation3 + $0xf0] sm:$0xff] %vm489_vm2, %v5274_v50  ;;  %4767 = vmatmul.mubr.msk.f32.vlgmr.msra.gmra.mrb[100].mxu1 %vm489_vm2, %v5274_v50 }
 0x761   :  { %5279 = vtanh.f32 %v5040_v51  ;;  %4769 = vmatprep.mubr.msk.f32.mxu1 %vm5319_vm1, %v5320_v36 }
 0x762   :  { %v2914_v2 = vpop.f32.mrb[88].mxu0 }
 0x763   :  { %v5276_v54 = vpop.eup %5275  ;;  %v5041_v41 = vadd.f32 %v6145_v22, %v2914_v2  ;;  %v4734_v55 = vpop.f32.mrb[89].mxu0 }
 0x764   :  { %2929 = vst.msk [vmem:[#allocation3 + $0xf8] sm:$0xff] %vm489_vm2, %v5276_v54  ;;  %4770 = vmatmul.mubr.msk.f32.gmra.mrb[102].mxu1 %vm489_vm2, %v5276_v54 }
 0x765   :  { %5281 = vtanh.f32 %v5041_v41  ;;  %4772 = vmatprep.mubr.msk.f32.mxu1 %vm5319_vm1, %v5320_v36 }
 0x766   :  { %v4791_v57 = vpop.f32.mrb[90].mxu0 }
 0x767   :  { %v5278_v58 = vpop.eup %5277  ;;  %v3412_v59 = vadd.f32 %v4791_v57, %v6267_v56  ;;  %v3406_v60 = vpop.f32.mrb[91].mxu0  ;;  %v3199_v61 = vld [vmem:[#allocation3 + $0xf0] sm:$0xff] }
 0x768   :  { %2930 = vst.msk [vmem:[#allocation3 + $0x100] sm:$0xff] %vm489_vm2, %v5278_v58  ;;  %v3407_v63 = vadd.f32 %v6267_v56, %v3406_v60  ;;  %4773 = vmatmul.mubr.msk.f32.gmra.mrb[104].mxu1 %vm489_vm2, %v5278_v58  ;;  %4834 = vmatprep.mubr.msk.f32.mxu0 %vm489_vm2, %v3199_v61 }
 0x769   :  { %3606 = vst [vmem:[#allocation4 + $0x8] sm:$0xff] %v3412_v59  ;;  %4775 = vmatprep.mubr.msk.f32.mxu1 %vm5319_vm1, %v5320_v36 }
 0x76a   :  { %3605 = vst [vmem:[#allocation4] sm:$0xff] %v3407_v63  ;;  %v4794_v0 = vpop.f32.mrb[92].mxu0 }
 0x76b   :  { %v5280_v7 = vpop.eup %5279  ;;  %v3422_v1 = vadd.f32 %v4794_v0, %v6267_v56  ;;  %v3416_v3 = vpop.f32.mrb[93].mxu0  ;;  %v3200_v15 = vld [vmem:[#allocation3 + $0xf8] sm:$0xff] }
 0x76c   :  { %2931 = vst.msk [vmem:[#allocation3 + $0x108] sm:$0xff] %vm489_vm2, %v5280_v7  ;;  %v3417_v4 = vadd.f32 %v6267_v56, %v3416_v3  ;;  %4776 = vmatmul.mubr.msk.f32.gmra.mrb[106].mxu1 %vm489_vm2, %v5280_v7  ;;  %4835 = vmatmul.mubr.msk.f32.gmra.mrb[120].mxu0 %vm489_vm2, %v3200_v15 }
 0x76d   :  { %3608 = vst [vmem:[#allocation4 + $0x18] sm:$0xff] %v3422_v1  ;;  %4778 = vmatprep.mubr.msk.f32.mxu1 %vm5319_vm1, %v5320_v36 }
 0x76e   :  { %3607 = vst [vmem:[#allocation4 + $0x10] sm:$0xff] %v3417_v4  ;;  %v4797_v5 = vpop.f32.mrb[94].mxu0 }
 0x76f   :  { %v5282_v6 = vpop.eup %5281  ;;  %v3432_v9 = vadd.f32 %v4797_v5, %v6267_v56  ;;  %v3426_v11 = vpop.f32.mrb[95].mxu0  ;;  %v3201_v12 = vld [vmem:[#allocation3 + $0x100] sm:$0xff] }
 0x770   :  { %2932 = vst.msk [vmem:[#allocation3 + $0x110] sm:$0xff] %vm489_vm2, %v5282_v6  ;;  %v3427_v14 = vadd.f32 %v6267_v56, %v3426_v11  ;;  %4779 = vmatmul.mubr.msk.f32.gmra.mrb[108].mxu1 %vm489_vm2, %v5282_v6  ;;  %4837 = vmatprep.mubr.msk.f32.mxu0 %vm489_vm2, %v3201_v12 }
 0x771   :  { %3610 = vst [vmem:[#allocation4 + $0x28] sm:$0xff] %v3432_v9 }
 0x772   :  { %3609 = vst [vmem:[#allocation4 + $0x20] sm:$0xff] %v3427_v14  ;;  %v4800_v16 = vpop.f32.mrb[96].mxu0 }
 0x773   :  { %v3442_v36 = vadd.f32 %v4800_v16, %v6267_v56  ;;  %v3436_v53 = vpop.f32.mrb[97].mxu0  ;;  %v3202_v17 = vld [vmem:[#allocation3 + $0x108] sm:$0xff] }
 0x774   :  { %v3437_v18 = vadd.f32 %v6267_v56, %v3436_v53  ;;  %4838 = vmatmul.mubr.msk.f32.gmra.mrb[122].mxu0 %vm489_vm2, %v3202_v17 }
 0x775   :  { %3612 = vst [vmem:[#allocation4 + $0x38] sm:$0xff] %v3442_v36 }
 0x776   :  { %3611 = vst [vmem:[#allocation4 + $0x30] sm:$0xff] %v3437_v18  ;;  %v4803_v62 = vpop.f32.mrb[98].mxu0 }
 0x777   :  { %v3452_v19 = vadd.f32 %v4803_v62, %v6267_v56  ;;  %v3446_v20 = vpop.f32.mrb[99].mxu0  ;;  %v3203_v21 = vld [vmem:[#allocation3 + $0x110] sm:$0xff] }
 0x778   :  { %v3447_v23 = vadd.f32 %v6267_v56, %v3446_v20  ;;  %4840 = vmatprep.mubr.msk.f32.mxu0 %vm489_vm2, %v3203_v21 }
 0x779   :  { %3614 = vst [vmem:[#allocation4 + $0x48] sm:$0xff] %v3452_v19 }
 0x77a   :  { %3613 = vst [vmem:[#allocation4 + $0x40] sm:$0xff] %v3447_v23  ;;  %v4806_v24 = vpop.f32.mrb[100].mxu0 }
 0x77b   :  { %v3462_v25 = vadd.f32 %v4806_v24, %v6267_v56  ;;  %v3456_v26 = vpop.f32.mrb[101].mxu0 }
 0x77c   :  { %v3457_v27 = vadd.f32 %v6267_v56, %v3456_v26 }
 0x77d   :  { %3616 = vst [vmem:[#allocation4 + $0x58] sm:$0xff] %v3462_v25 }
 0x77e   :  { %3615 = vst [vmem:[#allocation4 + $0x50] sm:$0xff] %v3457_v27  ;;  %v4809_v28 = vpop.f32.mrb[102].mxu0 }
 0x77f   :  { %v3472_v29 = vadd.f32 %v4809_v28, %v6267_v56  ;;  %v3466_v30 = vpop.f32.mrb[103].mxu0 }
 0x780   :  { %v3467_v31 = vadd.f32 %v6267_v56, %v3466_v30 }
 0x781   :  { %3618 = vst [vmem:[#allocation4 + $0x68] sm:$0xff] %v3472_v29 }
 0x782   :  { %3617 = vst [vmem:[#allocation4 + $0x60] sm:$0xff] %v3467_v31  ;;  %v4812_v32 = vpop.f32.mrb[104].mxu0 }
 0x783   :  { %v3482_v33 = vadd.f32 %v4812_v32, %v6267_v56  ;;  %v3476_v34 = vpop.f32.mrb[105].mxu0 }
 0x784   :  { %v3477_v35 = vadd.f32 %v6267_v56, %v3476_v34 }
 0x785   :  { %3620 = vst [vmem:[#allocation4 + $0x78] sm:$0xff] %v3482_v33 }
 0x786   :  { %3619 = vst [vmem:[#allocation4 + $0x70] sm:$0xff] %v3477_v35  ;;  %v4815_v37 = vpop.f32.mrb[106].mxu0 }
 0x787   :  { %v3492_v38 = vadd.f32 %v4815_v37, %v6267_v56  ;;  %v3486_v10 = vpop.f32.mrb[107].mxu0 }
 0x788   :  { %v3487_v8 = vadd.f32 %v6267_v56, %v3486_v10 }
 0x789   :  { %3622 = vst [vmem:[#allocation4 + $0x88] sm:$0xff] %v3492_v38 }
 0x78a   :  { %3621 = vst [vmem:[#allocation4 + $0x80] sm:$0xff] %v3487_v8  ;;  %v4818_v13 = vpop.f32.mrb[108].mxu0 }
 0x78b   :  { %v3502_v39 = vadd.f32 %v4818_v13, %v6267_v56  ;;  %v3496_v40 = vpop.f32.mrb[109].mxu0 }
 0x78c   :  { %v3497_v42 = vadd.f32 %v6267_v56, %v3496_v40 }
 0x78d   :  { %3624 = vst [vmem:[#allocation4 + $0x98] sm:$0xff] %v3502_v39 }
 0x78e   :  { %3623 = vst [vmem:[#allocation4 + $0x90] sm:$0xff] %v3497_v42  ;;  %v4821_v43 = vpop.f32.mrb[110].mxu0 }
 0x78f   :  { %v3512_v44 = vadd.f32 %v4821_v43, %v6267_v56  ;;  %v3506_v45 = vpop.f32.mrb[111].mxu0 }
 0x790   :  { %v3507_v46 = vadd.f32 %v6267_v56, %v3506_v45 }
 0x791   :  { %3626 = vst [vmem:[#allocation4 + $0xa8] sm:$0xff] %v3512_v44 }
 0x792   :  { %3625 = vst [vmem:[#allocation4 + $0xa0] sm:$0xff] %v3507_v46  ;;  %v4824_v47 = vpop.f32.mrb[112].mxu0 }
 0x793   :  { %v3522_v48 = vadd.f32 %v4824_v47, %v6267_v56  ;;  %v3516_v49 = vpop.f32.mrb[113].mxu0 }
 0x794   :  { %v3517_v50 = vadd.f32 %v6267_v56, %v3516_v49 }
 0x795   :  { %3628 = vst [vmem:[#allocation4 + $0xb8] sm:$0xff] %v3522_v48 }
 0x796   :  { %3627 = vst [vmem:[#allocation4 + $0xb0] sm:$0xff] %v3517_v50  ;;  %v4827_v51 = vpop.f32.mrb[114].mxu0 }
 0x797   :  { %v3532_v52 = vadd.f32 %v4827_v51, %v6267_v56  ;;  %v3526_v2 = vpop.f32.mrb[115].mxu0 }
 0x798   :  { %v3527_v54 = vadd.f32 %v6267_v56, %v3526_v2 }
 0x799   :  { %3630 = vst [vmem:[#allocation4 + $0xc8] sm:$0xff] %v3532_v52 }
 0x79a   :  { %3629 = vst [vmem:[#allocation4 + $0xc0] sm:$0xff] %v3527_v54  ;;  %v4830_v41 = vpop.f32.mrb[116].mxu0 }
 0x79b   :  { %v3542_v55 = vadd.f32 %v4830_v41, %v6267_v56  ;;  %v3536_v57 = vpop.f32.mrb[117].mxu0 }
 0x79c   :  { %v3537_v58 = vadd.f32 %v6267_v56, %v3536_v57 }
 0x79d   :  { %3632 = vst [vmem:[#allocation4 + $0xd8] sm:$0xff] %v3542_v55 }
 0x79e   :  { %3631 = vst [vmem:[#allocation4 + $0xd0] sm:$0xff] %v3537_v58  ;;  %v4833_v59 = vpop.f32.mrb[118].mxu0 }
 0x79f   :  { %v3552_v60 = vadd.f32 %v4833_v59, %v6267_v56  ;;  %v3546_v61 = vpop.f32.mrb[119].mxu0 }
 0x7a0   :  { %v3547_v63 = vadd.f32 %v6267_v56, %v3546_v61 }
 0x7a1   :  { %3634 = vst [vmem:[#allocation4 + $0xe8] sm:$0xff] %v3552_v60 }
 0x7a2   :  { %3633 = vst [vmem:[#allocation4 + $0xe0] sm:$0xff] %v3547_v63 }
 0x833   :  { %v3119_v0 = vpop.f32.mrb[100].mxu1 }
 0x834   :  { %v5042_v7 = vadd.f32 %v6145_v22, %v3119_v0  ;;  %v4768_v1 = vpop.f32.mrb[101].mxu1 }
 0x836   :  { %5283 = vtanh.f32 %v5042_v7 }
 0x837   :  { %v3124_v3 = vpop.f32.mrb[102].mxu1 }
 0x838   :  { %v5043_v15 = vadd.f32 %v6145_v22, %v3124_v3  ;;  %v4771_v4 = vpop.f32.mrb[103].mxu1 }
 0x83a   :  { %5285 = vtanh.f32 %v5043_v15 }
 0x83b   :  { %v3129_v5 = vpop.f32.mrb[104].mxu1 }
 0x83c   :  { %v5044_v6 = vadd.f32 %v6145_v22, %v3129_v5  ;;  %v4774_v9 = vpop.f32.mrb[105].mxu1 }
 0x83e   :  { %5287 = vtanh.f32 %v5044_v6 }
 0x83f   :  { %v3134_v11 = vpop.f32.mrb[106].mxu1  ;;  %v4836_v12 = vpop.f32.mrb[120].mxu0 }
 0x840   :  { %v5284_v14 = vpop.eup %5283  ;;  %v5045_v16 = vadd.f32 %v6145_v22, %v3134_v11  ;;  %v3562_v36 = vadd.f32 %v4836_v12, %v6267_v56  ;;  %v4777_v53 = vpop.f32.mrb[107].mxu1 }
 0x841   :  { %v3556_v17 = vpop.f32.mrb[121].mxu0  ;;  %3153 = vst.msk [vmem:[#allocation3 + $0x118] sm:$0xff] %vm489_vm2, %v5284_v14  ;;  %3817 = vst.msk [vmem:[%s6383_s10 + $0x28] sm:$0xff] %vm489_vm2, %v5284_v14 }
 0x842   :  { %v3557_v18 = vadd.f32 %v6267_v56, %v3556_v17  ;;  %5289 = vtanh.f32 %v5045_v16  ;;  %3636 = vst [vmem:[#allocation4 + $0xf8] sm:$0xff] %v3562_v36 }
 0x843   :  { %v3139_v62 = vpop.f32.mrb[108].mxu1 }
 0x844   :  { %3635 = vst [vmem:[#allocation4 + $0xf0] sm:$0xff] %v3557_v18  ;;  %v5286_v19 = vpop.eup %5285  ;;  %v5046_v20 = vadd.f32 %v6145_v22, %v3139_v62  ;;  %v4780_v21 = vpop.f32.mrb[109].mxu1 }
 0x845   :  { %3154 = vst.msk [vmem:[#allocation3 + $0x120] sm:$0xff] %vm489_vm2, %v5286_v19  ;;  %3818 = vst.msk [vmem:[%s6383_s10 + $0x30] sm:$0xff] %vm489_vm2, %v5286_v19 }
 0x846   :  { %5291 = vtanh.f32 %v5046_v20 }
 0x847   :  { %v4839_v23 = vpop.f32.mrb[122].mxu0 }
 0x848   :  { %v5288_v24 = vpop.eup %5287  ;;  %v3572_v25 = vadd.f32 %v4839_v23, %v6267_v56  ;;  %v3566_v26 = vpop.f32.mrb[123].mxu0  ;;  %v3204_v27 = vld [vmem:[#allocation3 + $0x118] sm:$0xff] }
 0x849   :  { %3155 = vst.msk [vmem:[#allocation3 + $0x128] sm:$0xff] %vm489_vm2, %v5288_v24  ;;  %3819 = vst.msk [vmem:[%s6383_s10 + $0x38] sm:$0xff] %vm489_vm2, %v5288_v24  ;;  %v3567_v22 = vadd.f32 %v6267_v56, %v3566_v26  ;;  %4841 = vmatmul.mubr.msk.f32.gmra.mrb[124].mxu0 %vm489_vm2, %v3204_v27 }
 0x84a   :  { %3638 = vst [vmem:[#allocation4 + $0x108] sm:$0xff] %v3572_v25 }
 0x84b   :  { %3637 = vst [vmem:[#allocation4 + $0x100] sm:$0xff] %v3567_v22 }
 0x84c   :  { %v5290_v28 = vpop.eup %5289  ;;  %v3205_v29 = vld [vmem:[#allocation3 + $0x120] sm:$0xff] }
 0x84d   :  { %3156 = vst.msk [vmem:[#allocation3 + $0x130] sm:$0xff] %vm489_vm2, %v5290_v28  ;;  %3820 = vst.msk [vmem:[%s6383_s10 + $0x40] sm:$0xff] %vm489_vm2, %v5290_v28  ;;  %4843 = vmatprep.mubr.msk.f32.mxu0 %vm489_vm2, %v3205_v29 }
 0x850   :  { %v5292_v30 = vpop.eup %5291  ;;  %v3206_v31 = vld [vmem:[#allocation3 + $0x128] sm:$0xff] }
 0x851   :  { %3157 = vst.msk [vmem:[#allocation3 + $0x138] sm:$0xff] %vm489_vm2, %v5292_v30  ;;  %3821 = vst.msk [vmem:[%s6383_s10 + $0x48] sm:$0xff] %vm489_vm2, %v5292_v30  ;;  %4844 = vmatmul.mubr.msk.f32.gmra.mrb[126].mxu0 %vm489_vm2, %v3206_v31  ;;  %s5321_s10 = smov [#allocation4]  }
 0x852   :  { %s3650_s14 = sshll.u32 %s5321_s10, 4  ;;  %s3651_s14 = int_to_ptr.vmem [resolvable:$true] %s3650_s14 }
 0x853   :  { %s5294_s4 = scalar_lea.vmem %s3651_s14, 5120  ;;  %p5299_p1 = scmp.lt.s32.totalorder %s3651_s14, %s3651_s14 }
 0x854   :  { %v3207_v32 = vld [vmem:[#allocation3 + $0x130] sm:$0xff]  ;;  %p5295_p0 = scmp.ne.s32.totalorder %s3651_s14, %s5294_s4  ;;  %p5300_p2 = scmp.lt.s32.totalorder %s5294_s4, %s5294_s4 }
 0x855   :  { %4846 = vmatprep.mubr.msk.f32.mxu0 %vm489_vm2, %v3207_v32 }
 0x856   :  { %p5301_p3 = por %p5300_p2, %p5299_p1 }
 0x858   :  { %v3208_v33 = vld [vmem:[#allocation3 + $0x138] sm:$0xff]  ;;  %p5302_p4 = pnand %p5301_p3, %p5295_p0 }
 0x859   :  { %4847 = vmatmul.mubr.msk.f32.gmra.mrb[128].mxu0 %vm489_vm2, %v3208_v33 }
 0x91c   :  { %v4842_v34 = vpop.f32.mrb[124].mxu0 }
 0x91d   :  { %v3582_v35 = vadd.f32 %v4842_v34, %v6267_v56  ;;  %v3576_v37 = vpop.f32.mrb[125].mxu0 }
 0x91e   :  { %v3577_v38 = vadd.f32 %v6267_v56, %v3576_v37 }
 0x91f   :  { %3640 = vst [vmem:[#allocation4 + $0x118] sm:$0xff] %v3582_v35 }
 0x920   :  { %3639 = vst [vmem:[#allocation4 + $0x110] sm:$0xff] %v3577_v38 }
 0x924   :  { %v4845_v10 = vpop.f32.mrb[126].mxu0 }
 0x925   :  { %v3592_v8 = vadd.f32 %v4845_v10, %v6267_v56  ;;  %v3586_v13 = vpop.f32.mrb[127].mxu0 }
 0x926   :  { %v3587_v39 = vadd.f32 %v6267_v56, %v3586_v13 }
 0x927   :  { %3642 = vst [vmem:[#allocation4 + $0x128] sm:$0xff] %v3592_v8 }
 0x928   :  { %3641 = vst [vmem:[#allocation4 + $0x120] sm:$0xff] %v3587_v39 }
 0x92c   :  { %v4848_v40 = vpop.f32.mrb[128].mxu0 }
 0x92d   :  { %v3602_v42 = vadd.f32 %v4848_v40, %v6267_v56  ;;  %v3596_v43 = vpop.f32.mrb[129].mxu0 }
 0x92e   :  { %v3597_v44 = vadd.f32 %v6267_v56, %v3596_v43 }
 0x92f   :  { %3644 = vst [vmem:[#allocation4 + $0x138] sm:$0xff] %v3602_v42 }
 0x930   :  { %3643 = vst [vmem:[#allocation4 + $0x130] sm:$0xff] %v3597_v44 }
 0x931   :  { %5305 = shalt.err (!%p5302_p4)
}
 0x932   :  { %s5306_s2 = scalar_lea.hbm %s6382_s9, 5120 }
 0x933   :  { %p5307_p5 = scmp.ne.s32.totalorder %s6382_s9, %s5306_s2  ;;  %p5310_p6 = scmp.lt.u32.totalorder %s5306_s2, %s6382_s9 }
 0x935   :  { %p5312_p7 = pnand %p5310_p6, %p5307_p5 }
 0x937   :  { %5315 = shalt.err (!%p5312_p7)
}
 0x938   :  { %s5322_s19 = smov 128   ;;  %s5323_s20 = smov 8  }
 0x939   :  { %3656 = dma.vmem_to_hbm [thread:$0]  %s3651_s14, 5120, %s6382_s9, [#allocation5], %s5322_s19, %s5322_s19, %s5323_s20  }
 0x93a   :  { %5316 = dma.done.wait [#allocation5], 5120  }
 0x93b   :  { %5317 = vsyncadd [#allocation5], 4294962176 }
 0x93c   :  { %3664 = vsyncpa [#allocation5], 1 }

</bundles_post_ra>
